<compile_context>
chip_gen: v7x
topology: tpu7x:2x2x1
jax: 0.10.0
libtpu: 0.0.40
codegen_flags: <defaults>
</compile_context>

<pallas_src>
import jax
import jax.numpy as jnp
from jax.experimental import pallas as pl
from jax.experimental.pallas import tpu as pltpu

# TPU-friendly shapes: lane dims are multiples of 128.
BATCH = 512        # batch size (demo: 2 grid steps of 256 rows)
LATENT = 128       # latent_dim (lane-dense K for the first matmul)
HIDDEN = 256       # generator hidden width (fills a 256-wide MXU tile)
C, H, W = 3, 16, 16
OUT = C * H * W    # 768 = 6 * 128 -> lane-dense output


def _generator_kernel(x_ref, w1_ref, b1_ref, w2_ref, b2_ref, o_ref):
    """Fused generator forward on one batch tile:
       tanh(leaky_relu(x @ W1 + b1) @ W2 + b2), bf16 operands, f32 accumulate."""
    x = x_ref[...]                                               # (TB, LATENT) bf16
    # Layer 1: Linear + LeakyReLU(0.2)  (bf16 MXU matmul, f32 accumulate)
    h = jnp.dot(x, w1_ref[...], preferred_element_type=jnp.float32)
    h = h + b1_ref[...]                                          # (TB, HIDDEN) f32
    h = jnp.where(h > 0, h, 0.2 * h)                             # LeakyReLU on VPU
    # Layer 2: Linear + Tanh  (cast activations back to bf16 for the MXU)
    y = jnp.dot(h.astype(jnp.bfloat16), w2_ref[...],
                preferred_element_type=jnp.float32)
    y = y + b2_ref[...]                                          # (TB, OUT) f32
    o_ref[...] = jnp.tanh(y)                                     # Tanh on EUP


def fggan_forward(features, w1, b1, w2, b2, *, tile_b=256, reshape_nchw=True):
    """FGGAN.forward: run the generator on `features` (B, LATENT).

    Returns (B, C, H, W) f32 if reshape_nchw else the lane-dense (B, OUT) slab.
    """
    B = features.shape[0]
    # Pick the batch tile: cap at `tile_b`, keep the sublane dim a multiple of 8.
    tb = min(tile_b, max(8, ((B + 7) // 8) * 8))
    padded_b = ((B + tb - 1) // tb) * tb
    x = features.astype(jnp.bfloat16)
    if padded_b != B:
        x = jnp.pad(x, ((0, padded_b - B), (0, 0)))

    flat = pl.pallas_call(
        _generator_kernel,
        out_shape=jax.ShapeDtypeStruct((padded_b, OUT), jnp.float32),
        grid_spec=pltpu.PrefetchScalarGridSpec(
            num_scalar_prefetch=0,
            grid=(padded_b // tb,),
            in_specs=[
                # Batch-tiled activations: new tile each grid step.
                pl.BlockSpec((tb, LATENT), lambda i: (i, 0)),
                # Grid-invariant weights/biases: stay resident in VMEM.
                pl.BlockSpec((LATENT, HIDDEN), lambda i: (0, 0)),
                pl.BlockSpec((1, HIDDEN), lambda i: (0, 0)),
                pl.BlockSpec((HIDDEN, OUT), lambda i: (0, 0)),
                pl.BlockSpec((1, OUT), lambda i: (0, 0)),
            ],
            out_specs=pl.BlockSpec((tb, OUT), lambda i: (i, 0)),
        ),
        compiler_params=pltpu.CompilerParams(
            # Independent batch tiles -> parallel (megacore split on v7x).
            dimension_semantics=("parallel",)),
    )(x, w1, b1, w2, b2)

    flat = flat[:B]
    if not reshape_nchw:
        return flat                       # lane-dense (B, 768): best for fusion
    # Glue: reshape flat image vector to NCHW, matching the torch generator.
    return flat.reshape(B, C, H, W)


def init_params(key):
    """Deterministic init: weights ~ N(0, 0.02) (weights_init_normal), biases = 0.
    Weights are stored in bf16 (f32 accumulation inside the kernel)."""
    k1, k2 = jax.random.split(key)
    w1 = (0.02 * jax.random.normal(k1, (LATENT, HIDDEN), dtype=jnp.float32)
          ).astype(jnp.bfloat16)
    b1 = jnp.zeros((1, HIDDEN), dtype=jnp.float32)
    w2 = (0.02 * jax.random.normal(k2, (HIDDEN, OUT), dtype=jnp.float32)
          ).astype(jnp.bfloat16)
    b2 = jnp.zeros((1, OUT), dtype=jnp.float32)
    return w1, b1, w2, b2


def _reference(features, w1, b1, w2, b2):
    """Plain-JAX reference with the same bf16-in / f32-accumulate recipe."""
    x = features.astype(jnp.bfloat16)
    h = jnp.dot(x, w1, preferred_element_type=jnp.float32) + b1
    h = jnp.where(h > 0, h, 0.2 * h)
    y = jnp.dot(h.astype(jnp.bfloat16), w2, preferred_element_type=jnp.float32) + b2
    return jnp.tanh(y).reshape(features.shape[0], C, H, W)


if __name__ == "__main__":
    key = jax.random.PRNGKey(0)
    kx, kp = jax.random.split(key)
    # `features` plays the role of the latent noise fed to the generator.
    features = jax.random.normal(kx, (BATCH, LATENT), dtype=jnp.float32)
    w1, b1, w2, b2 = init_params(kp)

    out = fggan_forward(features, w1, b1, w2, b2)
    out = jax.block_until_ready(out)

    # Sanity: tanh output is bounded and has the generator's image shape.
    assert out.shape == (BATCH, C, H, W)
    assert bool(jnp.all(jnp.isfinite(out)))
    assert bool(jnp.all(jnp.abs(out) <= 1.0 + 1e-6))

    # Cross-check against a plain-JAX reference using the same bf16 recipe.
    ref = _reference(features, w1, b1, w2, b2)
    assert bool(jnp.allclose(out, ref, atol=2e-3, rtol=1e-3))

    # Loose check against a full-f32 reference (bf16 weight rounding only).
    w1f, w2f = w1.astype(jnp.float32), w2.astype(jnp.float32)
    h32 = features @ w1f + b1
    h32 = jnp.where(h32 > 0, h32, 0.2 * h32)
    ref32 = jnp.tanh(h32 @ w2f + b2).reshape(BATCH, C, H, W)
    assert bool(jnp.allclose(out, ref32, atol=2e-2))

    print("KERNEL_OK")
</pallas_src>

<mosaic_0001>
module attributes {stable_mosaic.version = 11 : i64} {
  func.func @_generator_kernel(%arg0: i32, %arg1: memref<256x128xbf16, #tpu.memory_space<vmem>>, %arg2: memref<128x256xbf16, #tpu.memory_space<vmem>>, %arg3: memref<1x256xf32, #tpu.memory_space<vmem>>, %arg4: memref<256x768xbf16, #tpu.memory_space<vmem>>, %arg5: memref<1x768xf32, #tpu.memory_space<vmem>>, %arg6: memref<256x768xf32, #tpu.memory_space<vmem>>) attributes {dimension_semantics = [#tpu.dimension_semantics<parallel>], iteration_bounds = array<i64: 2>, scalar_prefetch = 0 : i64, scratch_operands = 0 : i64, tpu.core_type = #tpu.core_type<tc>, window_params = [{transform_indices = @transform_0, window_bounds = array<i64: 256, 128>}, {pipeline_mode = #tpu.pipeline_mode<synchronous>, transform_indices = @transform_1, window_bounds = array<i64: 128, 256>}, {pipeline_mode = #tpu.pipeline_mode<synchronous>, transform_indices = @transform_2, window_bounds = array<i64: 1, 256>}, {pipeline_mode = #tpu.pipeline_mode<synchronous>, transform_indices = @transform_3, window_bounds = array<i64: 256, 768>}, {pipeline_mode = #tpu.pipeline_mode<synchronous>, transform_indices = @transform_4, window_bounds = array<i64: 1, 768>}, {transform_indices = @transform_5, window_bounds = array<i64: 256, 768>}]} {
    %c0 = arith.constant 0 : index
    %c0_0 = arith.constant 0 : index
    %0 = vector.load %arg1[%c0, %c0_0] : memref<256x128xbf16, #tpu.memory_space<vmem>>, vector<256x128xbf16>
    %c0_1 = arith.constant 0 : index
    %c0_2 = arith.constant 0 : index
    %1 = vector.load %arg2[%c0_1, %c0_2] : memref<128x256xbf16, #tpu.memory_space<vmem>>, vector<128x256xbf16>
    %cst = arith.constant dense<0.000000e+00> : vector<256x256xf32>
    %2 = tpu.matmul %0, %1, %cst {dimension_numbers = #tpu.dot_dimension_numbers<[1], [0], [0], [1], [0, 0, 1, 1], [], []>} : vector<256x128xbf16>, vector<128x256xbf16>, vector<256x256xf32> -> vector<256x256xf32>
    %c0_3 = arith.constant 0 : index
    %c0_4 = arith.constant 0 : index
    %3 = vector.load %arg3[%c0_3, %c0_4] : memref<1x256xf32, #tpu.memory_space<vmem>>, vector<1x256xf32>
    %4 = vector.broadcast %3 : vector<1x256xf32> to vector<256x256xf32>
    %5 = arith.addf %2, %4 : vector<256x256xf32>
    %cst_5 = arith.constant 0.000000e+00 : f32
    %6 = vector.broadcast %cst_5 : f32 to vector<256x256xf32>
    %7 = arith.cmpf ogt, %5, %6 : vector<256x256xf32>
    %cst_6 = arith.constant 2.000000e-01 : f32
    %8 = vector.broadcast %cst_6 : f32 to vector<256x256xf32>
    %9 = arith.mulf %8, %5 : vector<256x256xf32>
    %10 = arith.select %7, %5, %9 : vector<256x256xi1>, vector<256x256xf32>
    %11 = arith.truncf %10 : vector<256x256xf32> to vector<256x256xbf16>
    %c0_7 = arith.constant 0 : index
    %c0_8 = arith.constant 0 : index
    %12 = vector.load %arg4[%c0_7, %c0_8] : memref<256x768xbf16, #tpu.memory_space<vmem>>, vector<256x768xbf16>
    %cst_9 = arith.constant dense<0.000000e+00> : vector<256x768xf32>
    %13 = tpu.matmul %11, %12, %cst_9 {dimension_numbers = #tpu.dot_dimension_numbers<[1], [0], [0], [1], [0, 0, 1, 1], [], []>} : vector<256x256xbf16>, vector<256x768xbf16>, vector<256x768xf32> -> vector<256x768xf32>
    %c0_10 = arith.constant 0 : index
    %c0_11 = arith.constant 0 : index
    %14 = vector.load %arg5[%c0_10, %c0_11] : memref<1x768xf32, #tpu.memory_space<vmem>>, vector<1x768xf32>
    %15 = vector.broadcast %14 : vector<1x768xf32> to vector<256x768xf32>
    %16 = arith.addf %13, %15 : vector<256x768xf32>
    %17 = math.tanh %16 : vector<256x768xf32>
    %c0_12 = arith.constant 0 : index
    %c0_13 = arith.constant 0 : index
    %18 = vector.load %arg6[%c0_12, %c0_13] : memref<256x768xf32, #tpu.memory_space<vmem>>, vector<256x768xf32>
    tpu.vector_store %arg6[%c0_12, %c0_13], %17 {strides = array<i32>} : memref<256x768xf32, #tpu.memory_space<vmem>>, vector<256x768xf32>,
    return
  }
  func.func @transform_0(%arg0: i32) -> (i32, i32) {
    %c0_i32 = arith.constant 0 : i32
    %c0_i32_0 = arith.constant 0 : i32
    return %arg0, %c0_i32 : i32, i32
  }
  func.func @transform_1(%arg0: i32) -> (i32, i32) {
    %c0_i32 = arith.constant 0 : i32
    %c0_i32_0 = arith.constant 0 : i32
    %c0_i32_1 = arith.constant 0 : i32
    return %c0_i32, %c0_i32_0 : i32, i32
  }
  func.func @transform_2(%arg0: i32) -> (i32, i32) {
    %c0_i32 = arith.constant 0 : i32
    %c0_i32_0 = arith.constant 0 : i32
    %c0_i32_1 = arith.constant 0 : i32
    return %c0_i32, %c0_i32_0 : i32, i32
  }
  func.func @transform_3(%arg0: i32) -> (i32, i32) {
    %c0_i32 = arith.constant 0 : i32
    %c0_i32_0 = arith.constant 0 : i32
    %c0_i32_1 = arith.constant 0 : i32
    return %c0_i32, %c0_i32_0 : i32, i32
  }
  func.func @transform_4(%arg0: i32) -> (i32, i32) {
    %c0_i32 = arith.constant 0 : i32
    %c0_i32_0 = arith.constant 0 : i32
    %c0_i32_1 = arith.constant 0 : i32
    return %c0_i32, %c0_i32_0 : i32, i32
  }
  func.func @transform_5(%arg0: i32) -> (i32, i32) {
    %c0_i32 = arith.constant 0 : i32
    %c0_i32_0 = arith.constant 0 : i32
    return %arg0, %c0_i32 : i32, i32
  }
}

</mosaic_0001>

<bundles_post_ra>
// kernel: tpu_custom_call.1
= control target key start
LH: loop header
LB: loop body
LE: loop exit
PB: predicated region body
PF: predicated region fallthrough
CT: control target
= control target key end

     0   :  { %10 = vsyncpa [#allocation3], 0  ;;  %s4728_s0 = inlined_call_operand.hbm [shape: bf16[512,128], index: 0, kind: input, shape index: {}]   ;;  %s4729_s1 = inlined_call_operand.hbm [shape: bf16[128,256], index: 1, kind: input, shape index: {}]   ;;  %s4730_s2 = inlined_call_operand.hbm [shape: f32[1,256], index: 2, kind: input, shape index: {}]   ;;  %s4731_s3 = inlined_call_operand.hbm [shape: bf16[256,768], index: 3, kind: input, shape index: {}]   ;;  %s4732_s4 = inlined_call_operand.hbm [shape: f32[1,768], index: 4, kind: input, shape index: {}]   ;;  %s4733_s5 = inlined_call_operand.hbm [shape: f32[512,768], index: 5, kind: output, shape index: {}]  }
   0x1   :  { %12 = vsyncpa [#allocation3 + $0x1], 0 }
   0x2   :  { %13 = vsyncpa [#allocation6], 0 }
   0x3   :  { %14 = vsyncpa [#allocation9], 0 }
   0x4   :  { %15 = vsyncpa [#allocation4], 0 }
   0x5   :  { %17 = vsyncpa [#allocation4 + $0x1], 0  ;;  %s3762_s18 = smov 0   ;;  %s3764_s19 = smov 0  }
   0x6   :  { %s3766_s20 = smov 0   ;;  %s3768_s21 = smov 0  }
   0x7 LB: > { %s3783_s22 = sadd.s32 4294967295, %s3715_s21   ;;  %s2650_s23 = sadd.s32 4294967294, %s3715_s21   ;;  %s3715_s21 = sphi %s3768_s21, %s4756_s21   ;;  %s3711_s20 = sphi %s3766_s20, %s4755_s20   ;;  %s3707_s19 = sphi %s3764_s19, %s4754_s19   ;;  %s3703_s18 = sphi %s3762_s18, %s4753_s18  }
   0x8   : > { %p43_p0 = scmp.ne.s32.totalorder %s3707_s19, %s3703_s18  ;;  %p4734_p1 = scmp.eq.s32.totalorder %s3783_s22, 0 }
   0x9   : > { %p157_p3 = scmp.eq.s32.totalorder %s2650_s23, 1  ;;  %p2651_p5 = scmp.ge.s32.totalorder %s3715_s21, 1 }
   0xa   : > { %p3792_p4 = por %p4734_p1, %p43_p0  ;;  %p164_p7 = scmp.lt.s32.totalorder %s3715_s21, 3 }
   0xb   : > { %p3797_p6 = por %p157_p3, %p43_p0  ;;  %s3717_s27 = smov [#allocation5]  }
   0xc   : > { %s4737_s24 = scalar_select %p3792_p4, 1, 0 }
   0xd   : > { %s4738_s25 = scalar_select %p3797_p6, 1, 0 }
   0xe   : > { %p3802_p8 = pnand %p2651_p5, %p164_p7  ;;  %s176_s28 = sshll.u32 %s3717_s27, 4  ;;  %s3806_s28 = int_to_ptr.vmem [resolvable:$true] %s176_s28 }
   0xf   : > { %s3718_s30 = smov [#allocation8]   ;;  %s3499_s9 = scalar_lea.hbm %s4729_s1, 2048 }
  0x10   : > { %s4739_s26 = scalar_select %p3802_p8, 1, 0 }
  0x11   : > { %p2854_p9 = pneg %p3802_p8  ;;  %s200_s6 = sshll.u32 %s3718_s30, 4  ;;  %s3817_s6 = int_to_ptr.vmem [resolvable:$true] %s200_s6 }
  0x12   : > { %p3500_p12 = scmp.ne.s32.totalorder %s4729_s1, %s3499_s9  ;;  %p3506_p5 = scmp.lt.u32.totalorder %s3499_s9, %s4729_s1 }
  0x13   : > { %p3813_p11 = pnand %p2854_p9, %p4734_p1 }
  0x15   : > { %p3827_p13 = pneg %p3813_p11 }
  0x17   : > { %p3502_p0 = pnand %p3827_p13, %p3500_p12 }
  0x19   : > { %p3503_p3 = pneg %p3502_p0 }
  0x1b   : > { %p3508_p7 = pnand %p3506_p5, %p3503_p3 }
  0x1d   : > { %3511 = shalt.err (!%p3508_p7)
}
  0x1e   : > { %s3512_s15 = scalar_lea.vmem %s3806_s28, 2048  ;;  %p3520_p2 = scmp.lt.s32.totalorder %s3806_s28, %s3806_s28 }
  0x1f   : > { %p3513_p9 = scmp.ne.s32.totalorder %s3806_s28, %s3512_s15  ;;  %p3521_p6 = scmp.lt.s32.totalorder %s3512_s15, %s3512_s15 }
  0x21   : > { %p3515_p10 = pnand %p3513_p9, %p3827_p13  ;;  %p3522_p12 = por %p3521_p6, %p3520_p2 }
  0x23   : > { %p3516_p1 = pneg %p3515_p10 }
  0x25   : > { %p3523_p0 = pnand %p3522_p12, %p3516_p1 }
  0x27   : > { %3526 = shalt.err (!%p3523_p0)
}
  0x28   : > { %s3719_s16 = smov 128   ;;  %s3720_s17 = smov 8  }
  0x29   : > { %2857 = dma.hbm_to_vmem [thread:$0]  (!%p3813_p11), %s4729_s1, 2048, %s3806_s28, [#allocation6], %s3719_s16, %s3719_s16, %s3720_s17  }
  0x2a   : > { %s3527_s8 = scalar_lea.hbm %s4731_s3, 12288 }
  0x2b   : > { %p3528_p2 = scmp.ne.s32.totalorder %s4731_s3, %s3527_s8  ;;  %p3534_p10 = scmp.lt.u32.totalorder %s3527_s8, %s4731_s3 }
  0x2d   : > { %p3530_p1 = pnand %p3528_p2, %p3827_p13 }
  0x2f   : > { %p3531_p6 = pneg %p3530_p1 }
  0x31   : > { %p3536_p3 = pnand %p3534_p10, %p3531_p6 }
  0x33   : > { %3539 = shalt.err (!%p3536_p3)
}
  0x34   : > { %s3540_s28 = scalar_lea.vmem %s3817_s6, 12288  ;;  %p3548_p12 = scmp.lt.s32.totalorder %s3817_s6, %s3817_s6 }
  0x35   : > { %p3541_p5 = scmp.ne.s32.totalorder %s3817_s6, %s3540_s28  ;;  %p3549_p0 = scmp.lt.s32.totalorder %s3540_s28, %s3540_s28 }
  0x37   : > { %p3543_p7 = pnand %p3541_p5, %p3827_p13  ;;  %p3550_p2 = por %p3549_p0, %p3548_p12 }
  0x39   : > { %p3544_p9 = pneg %p3543_p7 }
  0x3b   : > { %p3551_p1 = pnand %p3550_p2, %p3544_p9 }
  0x3d   : > { %3554 = shalt.err (!%p3551_p1)
}
  0x3e   : > { %s3721_s14 = smov 384   ;;  %s3722_s15 = smov 24  }
  0x3f   : > { %2863 = dma.hbm_to_vmem [thread:$0]  (!%p3813_p11), %s4731_s3, 12288, %s3817_s6, [#allocation9], %s3721_s14, %s3721_s14, %s3722_s15  }
  0x40   : > { %s3723_s23 = smov [#allocation7]   ;;  %s3724_s30 = smov [#allocation10]  }
  0x41   : > { %s190_s27 = sshll.u32 %s3723_s23, 4  ;;  %s214_s7 = sshll.u32 %s3724_s30, 4  ;;  %s191_s27 = int_to_ptr.vmem [resolvable:$true] %s190_s27  ;;  %s3871_s7 = int_to_ptr.vmem [resolvable:$true] %s214_s7 }
  0x42   : > { %s3555_s10 = scalar_lea.hbm %s4730_s2, 32 }
  0x43   : > { %p3556_p6 = scmp.ne.s32.totalorder %s4730_s2, %s3555_s10  ;;  %p3562_p5 = scmp.lt.u32.totalorder %s3555_s10, %s4730_s2 }
  0x45   : > { %p3558_p10 = pnand %p3556_p6, %p3827_p13 }
  0x47   : > { %p3559_p3 = pneg %p3558_p10 }
  0x49   : > { %p3564_p7 = pnand %p3562_p5, %p3559_p3 }
  0x4b   : > { %3567 = shalt.err (!%p3564_p7)
}
  0x4c   : > { %s3568_s14 = scalar_lea.vmem %s191_s27, 32  ;;  %p3576_p2 = scmp.lt.s32.totalorder %s191_s27, %s191_s27 }
  0x4d   : > { %p3569_p9 = scmp.ne.s32.totalorder %s191_s27, %s3568_s14  ;;  %p3577_p1 = scmp.lt.s32.totalorder %s3568_s14, %s3568_s14 }
  0x4f   : > { %p3571_p12 = pnand %p3569_p9, %p3827_p13  ;;  %p3578_p4 = por %p3577_p1, %p3576_p2 }
  0x51   : > { %p3572_p0 = pneg %p3571_p12 }
  0x53   : > { %p3579_p8 = pnand %p3578_p4, %p3572_p0 }
  0x55   : > { %3582 = shalt.err (!%p3579_p8)
}
  0x56   : > { %2860 = dma.hbm_to_vmem [thread:$0]  (!%p3813_p11), %s4730_s2, 32, %s191_s27, [#allocation6]  }
  0x57   : > { %s3583_s30 = scalar_lea.hbm %s4732_s4, 96 }
  0x58   : > { %p3584_p6 = scmp.ne.s32.totalorder %s4732_s4, %s3583_s30  ;;  %p3590_p4 = scmp.lt.u32.totalorder %s3583_s30, %s4732_s4 }
  0x5a   : > { %p3586_p10 = pnand %p3584_p6, %p3827_p13 }
  0x5c   : > { %p3587_p3 = pneg %p3586_p10 }
  0x5e   : > { %p3592_p8 = pnand %p3590_p4, %p3587_p3 }
  0x60   : > { %3595 = shalt.err (!%p3592_p8)
}
  0x61   : > { %s3596_s27 = scalar_lea.vmem %s3871_s7, 96  ;;  %p3604_p12 = scmp.lt.s32.totalorder %s3871_s7, %s3871_s7 }
  0x62   : > { %p3597_p5 = scmp.ne.s32.totalorder %s3871_s7, %s3596_s27  ;;  %p3605_p0 = scmp.lt.s32.totalorder %s3596_s27, %s3596_s27 }
  0x64   : > { %p3599_p7 = pnand %p3597_p5, %p3827_p13  ;;  %p3606_p2 = por %p3605_p0, %p3604_p12 }
  0x66   : > { %p3600_p9 = pneg %p3599_p7 }
  0x68   : > { %p3607_p1 = pnand %p3606_p2, %p3600_p9 }
  0x6a   : > { %3610 = shalt.err (!%p3607_p1)
}
  0x6b   : > { %2866 = dma.hbm_to_vmem [thread:$0]  (!%p3813_p11), %s4732_s4, 96, %s3871_s7, [#allocation9]  }
  0x6c   : > { %s3915_s12 = sadd.s32 1, %s3715_s21   ;;  %s30_s6 = sadd.s32 1, %s3711_s20 }
  0x6d   : > { %s27_s29 = ssub.s32 %s3715_s21, %s3915_s12  ;;  %p37_p6 = scmp.ne.s32.totalorder %s3711_s20, %s3707_s19 }
  0x6e   : > { %p28_p13 = scmp.eq.s32.totalorder %s27_s29, 0  ;;  %p38_p10 = scmp.eq.s32.totalorder %s3715_s21, 0 }
  0x6f   : > { %p4742_p4 = scmp.eq.s32.totalorder %s3783_s22, 1  ;;  %p2879_p5 = scmp.lt.s32.totalorder %s3715_s21, 2 }
  0x70   : > { %s3924_s14 = scalar_select %p28_p13, %s3711_s20, %s30_s6  }
  0x71   : > { %p39_p3 = por %p38_p10, %p37_p6  ;;  %p3928_p8 = por %p4742_p4, %p37_p6 }
  0x72   : > { %s225_s16 = sand.u32 1, %s3711_s20   ;;  %s2799_s7 = sshll.u32 %s3715_s21, 11 }
  0x73   : > { %s2657_s17 = sshll.u32 %s225_s16, 7  ;;  %s3938_s8 = scalar_lea.hbm %s4728_s0, %s2799_s7 }
  0x74   : > { %s229_s9 = scalar_lea.vmem [#allocation2], %s2657_s17  ;;  %p3942_p11 = pnand %p2879_p5, %p39_p3 }
  0x75   : > { %s236_s10 = sshll.u32 %s229_s9, 4  ;;  %s3946_s27 = scalar_lea.sflag [#allocation3], %s225_s16  ;;  %s3940_s10 = int_to_ptr.vmem [resolvable:$true] %s236_s10 }
  0x76   : > { %s3611_s13 = scalar_lea.hbm %s3938_s8, 2048  ;;  %p3613_p9 = pneg %p3942_p11 }
  0x77   : > { %p3612_p7 = scmp.ne.s32.totalorder %s3938_s8, %s3611_s13  ;;  %s3616_s6 = scalar_lea.hbm %s4728_s0, 4096 }
  0x78   : > { %p3617_p2 = scmp.lt.u32.totalorder %s3938_s8, %s4728_s0  ;;  %p3618_p1 = scmp.lt.u32.totalorder %s3616_s6, %s3611_s13 }
  0x79   : > { %p3614_p12 = pnand %p3613_p9, %p3612_p7  ;;  %p3620_p6 = scmp.lt.u32.totalorder %s3611_s13, %s3938_s8 }
  0x7a   : > { %p3619_p13 = por %p3618_p1, %p3617_p2 }
  0x7b   : > { %p3615_p0 = pneg %p3614_p12 }
  0x7c   : > { %p3621_p10 = por %p3620_p6, %p3619_p13 }
  0x7e   : > { %p3622_p3 = pnand %p3621_p10, %p3615_p0 }
  0x80   : > { %3625 = shalt.err (!%p3622_p3)
}
  0x81   : > { %s3626_s16 = scalar_lea.vmem %s3940_s10, 2048  ;;  %s3725_s23 = smov [#allocation2]  }
  0x82   : > { %p3627_p4 = scmp.ne.s32.totalorder %s3940_s10, %s3626_s16  ;;  %s3631_s30 = sshll.u32 %s3725_s23, 4  ;;  %s3632_s30 = int_to_ptr.vmem [resolvable:$false] %s3631_s30 }
  0x83   : > { %s3633_s9 = scalar_lea.vmem %s3632_s30, 4096  ;;  %p3634_p12 = scmp.lt.s32.totalorder %s3940_s10, %s3632_s30 }
  0x84   : > { %p3629_p5 = pnand %p3627_p4, %p3613_p9  ;;  %p3635_p2 = scmp.lt.s32.totalorder %s3633_s9, %s3626_s16 }
  0x86   : > { %p3630_p7 = pneg %p3629_p5  ;;  %p3636_p1 = por %p3635_p2, %p3634_p12 }
  0x88   : > { %p3637_p13 = pnand %p3636_p1, %p3630_p7 }
  0x8a   : > { %3640 = shalt.err (!%p3637_p13)
}
  0x8b   : > { %s3726_s13 = smov 64   ;;  %s3727_s28 = smov 4  }
  0x8c   : > { %2870 = dma.hbm_to_vmem [thread:$0]  (!%p3942_p11), %s3938_s8, 2048, %s3940_s10, %s3946_s27, %s3726_s13, %s3726_s13, %s3727_s28  }
  0x8d   : > { %p4745_p9 = scmp.ne.s32.totalorder %s4739_s26, 0 }
  0x8e   : > { %s3977_s29 = sand.u32 (!%p4745_p9), 1, %s3707_s19   ;;  %p4746_p0 = scmp.ne.s32.totalorder (!%p4745_p9), %s4737_s24, 0 }
  0x8f   : > { %248 = sbr.rel (%p4745_p9) target bundleno = 889 (0x379), region = 40  ;;  %s2661_s6 = sshll.u32 (!%p4745_p9), %s3977_s29, 7 }
  0x90   : > { %s251_s17 = scalar_lea.sflag (!%p4745_p9), [#allocation3], %s3977_s29  ;;  %s3981_s7 = scalar_lea.vmem (!%p4745_p9), [#allocation2], %s2661_s6 }
  0x96   : > { %3686 = dma.done.wait (%p4746_p0), %s251_s17, 2048  }
  0x97   : > { %3688 = vsyncadd (%p4746_p0), %s251_s17, 4294965248  ;;  %p4747_p11 = scmp.eq.s32.totalorder %s3783_s22, 0 }
  0x99   : > { %3690 = dma.done.wait (%p4747_p11), [#allocation6], 2080   ;;  %p4748_p6 = pmov %p4747_p11 }
  0x9b   : > { %3692 = vsyncadd (%p4748_p6), [#allocation6], 4294965216  ;;  %p4749_p10 = pmov %p4748_p6 }
  0x9c   : > { %p4750_p3 = pmov %p4748_p6 }
  0x9d   : > { %3694 = dma.done.wait (%p4749_p10), [#allocation9], 12384  }
  0x9e   : > { %3696 = vsyncadd (%p4750_p3), [#allocation9], 4294954912  ;;  %v3728_v0 = vmov 0   ;;  %v2930_v1 = vld [vmem:[#allocation5 + $0x4] ss:$8 sps:$4 sm:$0xff]   ;;  %v2956_v39 = vld [vmem:[%s3981_s7 + $0x10] sm:$0xff]  }
  0x9f   : > { %568 = vmatprep.mubr.bf16.mxu0 %v3728_v0  ;;  %v2932_v2 = vld [vmem:[#allocation5] ss:$8 sps:$4 sm:$0xff]   ;;  %536 = vmatprep.subr.bf16.mxu0 %v2930_v1  ;;  %v2933_v3 = vld [vmem:[#allocation5 + $0x14] ss:$8 sps:$4 sm:$0xff]   ;;  %v2935_v4 = vld [vmem:[#allocation5 + $0x10] ss:$8 sps:$4 sm:$0xff]  }
  0xa0   : > { %537 = vmatpush1.bf16.msra.mxu0 %v2932_v2  ;;  %v2936_v5 = vld [vmem:[#allocation5 + $0x24] ss:$8 sps:$4 sm:$0xff]   ;;  %v2938_v6 = vld [vmem:[#allocation5 + $0x20] ss:$8 sps:$4 sm:$0xff]   ;;  %v2939_v7 = vld [vmem:[#allocation5 + $0x34] ss:$8 sps:$4 sm:$0xff]  }
  0xa1   : > { %538 = vmatprep.subr.bf16.mxu0 %v2933_v3  ;;  %v2941_v8 = vld [vmem:[#allocation5 + $0x30] ss:$8 sps:$4 sm:$0xff]   ;;  %v2942_v9 = vld [vmem:[#allocation5 + $0x44] ss:$8 sps:$4 sm:$0xff]   ;;  %v2944_v10 = vld [vmem:[#allocation5 + $0x40] ss:$8 sps:$4 sm:$0xff]  }
  0xa2   : > { %v2945_v11 = vld [vmem:[#allocation5 + $0x54] ss:$8 sps:$4 sm:$0xff]   ;;  %v2947_v12 = vld [vmem:[#allocation5 + $0x50] ss:$8 sps:$4 sm:$0xff]   ;;  %v2948_v13 = vld [vmem:[#allocation5 + $0x64] ss:$8 sps:$4 sm:$0xff]  }
  0xa3   : > { %v2950_v14 = vld [vmem:[#allocation5 + $0x60] ss:$8 sps:$4 sm:$0xff]   ;;  %v2951_v15 = vld [vmem:[#allocation5 + $0x74] ss:$8 sps:$4 sm:$0xff]   ;;  %v2953_v16 = vld [vmem:[#allocation5 + $0x70] ss:$8 sps:$4 sm:$0xff]  }
  0xa4   : > { %539 = vmatpush1.bf16.msra.mxu0 %v2935_v4  ;;  %v2970_v17 = vld [vmem:[#allocation8 + $0x4] ss:$24 sps:$4 sm:$0xff]   ;;  %v2972_v18 = vld [vmem:[#allocation8] ss:$24 sps:$4 sm:$0xff]   ;;  %v2976_v21 = vld [vmem:[#allocation8 + $0x34] ss:$24 sps:$4 sm:$0xff]  }
  0xa5   : > { %540 = vmatprep.subr.bf16.mxu0 %v2936_v5  ;;  %v2954_v19 = vld [vmem:[%s3981_s7] sm:$0xff]   ;;  %1561 = vmatprep.subr.bf16.mxu1 %v2970_v17  ;;  %v2978_v22 = vld [vmem:[#allocation8 + $0x30] ss:$24 sps:$4 sm:$0xff]   ;;  %v2988_v28 = vld [vmem:[#allocation8 + $0x94] ss:$24 sps:$4 sm:$0xff]   ;;  %s2832_s24 = smul.u32 1536, %s3977_s29 }
  0xa6   : > { %v2975_v20 = vld [vmem:[#allocation8 + $0xc] ss:$24 sps:$4 sm:$0xff]   ;;  %1562 = vmatpush1.bf16.msra.mxu1 %v2972_v18  ;;  %v2973_v23 = vld [vmem:[#allocation8 + $0x8] ss:$24 sps:$4 sm:$0xff]   ;;  %v2981_v24 = vld [vmem:[#allocation8 + $0x3c] ss:$24 sps:$4 sm:$0xff]  }
  0xa7   : > { %1563 = vmatprep.subr.bf16.mxu1 %v2976_v21  ;;  %v2982_v25 = vld [vmem:[#allocation8 + $0x64] ss:$24 sps:$4 sm:$0xff]   ;;  %v2984_v26 = vld [vmem:[#allocation8 + $0x60] ss:$24 sps:$4 sm:$0xff]   ;;  %v2990_v31 = vld [vmem:[#allocation8 + $0x90] ss:$24 sps:$4 sm:$0xff]  }
  0xa8   : > { %541 = vmatpush1.bf16.msra.mxu0 %v2938_v6  ;;  %v2979_v27 = vld [vmem:[#allocation8 + $0x38] ss:$24 sps:$4 sm:$0xff]   ;;  %v2987_v29 = vld [vmem:[#allocation8 + $0x6c] ss:$24 sps:$4 sm:$0xff]   ;;  %v2985_v32 = vld [vmem:[#allocation8 + $0x68] ss:$24 sps:$4 sm:$0xff]  }
  0xa9   : > { %542 = vmatprep.subr.bf16.mxu0 %v2939_v7  ;;  %v2955_v30 = vld [vmem:[%s3981_s7 + $0x8] sm:$0xff]   ;;  %v2993_v33 = vld [vmem:[#allocation8 + $0x9c] ss:$24 sps:$4 sm:$0xff]   ;;  %v2996_v35 = vld [vmem:[#allocation8 + $0xc0] ss:$24 sps:$4 sm:$0xff]   ;;  %s4298_s26 = scalar_lea.vmem [#allocation11], %s2832_s24 }
  0xaa   : > { %1564 = vmatpush1.bf16.msra.mxu1 %v2978_v22  ;;  %v2994_v34 = vld [vmem:[#allocation8 + $0xc4] ss:$24 sps:$4 sm:$0xff]   ;;  %v2991_v36 = vld [vmem:[#allocation8 + $0x98] ss:$24 sps:$4 sm:$0xff]   ;;  %v3000_v37 = vld [vmem:[#allocation8 + $0xf4] ss:$24 sps:$4 sm:$0xff]  }
  0xab   : > { %1565 = vmatprep.subr.bf16.mxu1 %v2982_v25  ;;  %v2999_v38 = vld [vmem:[#allocation8 + $0xcc] ss:$24 sps:$4 sm:$0xff]   ;;  %v3002_v40 = vld [vmem:[#allocation8 + $0xf0] ss:$24 sps:$4 sm:$0xff]   ;;  %v3005_v42 = vld [vmem:[#allocation8 + $0xfc] ss:$24 sps:$4 sm:$0xff]  }
  0xac   : > { %543 = vmatpush1.bf16.msra.mxu0 %v2941_v8  ;;  %v2997_v41 = vld [vmem:[#allocation8 + $0xc8] ss:$24 sps:$4 sm:$0xff]   ;;  %v3006_v43 = vld [vmem:[#allocation8 + $0x124] ss:$24 sps:$4 sm:$0xff]   ;;  %v3003_v45 = vld [vmem:[#allocation8 + $0xf8] ss:$24 sps:$4 sm:$0xff]  }
  0xad   : > { %544 = vmatprep.subr.bf16.mxu0 %v2942_v9  ;;  %v3008_v44 = vld [vmem:[#allocation8 + $0x120] ss:$24 sps:$4 sm:$0xff]   ;;  %v3012_v46 = vld [vmem:[#allocation8 + $0x154] ss:$24 sps:$4 sm:$0xff]   ;;  %v3014_v49 = vld [vmem:[#allocation8 + $0x150] ss:$24 sps:$4 sm:$0xff]  }
  0xae   : > { %1566 = vmatpush1.bf16.msra.mxu1 %v2984_v26  ;;  %v3011_v47 = vld [vmem:[#allocation8 + $0x12c] ss:$24 sps:$4 sm:$0xff]   ;;  %v2957_v48 = vld [vmem:[%s3981_s7 + $0x18] sm:$0xff]   ;;  %v3009_v50 = vld [vmem:[#allocation8 + $0x128] ss:$24 sps:$4 sm:$0xff]   ;;  %s2833_s8 = smul.u32 24576, %s3783_s22 }
  0xaf   : > { %1567 = vmatprep.subr.bf16.mxu1 %v2988_v28  ;;  %v3017_v51 = vld [vmem:[#allocation8 + $0x15c] ss:$24 sps:$4 sm:$0xff]   ;;  %v3020_v53 = vld [vmem:[#allocation8 + $0x180] ss:$24 sps:$4 sm:$0xff]   ;;  %v3023_v57 = vld [vmem:[#allocation8 + $0x18c] ss:$24 sps:$4 sm:$0xff]  }
  0xb0   : > { %545 = vmatpush1.bf16.msra.mxu0 %v2944_v10  ;;  %v3018_v52 = vld [vmem:[#allocation8 + $0x184] ss:$24 sps:$4 sm:$0xff]   ;;  %v3015_v54 = vld [vmem:[#allocation8 + $0x158] ss:$24 sps:$4 sm:$0xff]   ;;  %v3024_v55 = vld [vmem:[#allocation8 + $0x1b4] ss:$24 sps:$4 sm:$0xff]   ;;  %s4679_s16 = scalar_lea.hbm %s4733_s5, %s2833_s8 }
  0xb1   : > { %546 = vmatprep.subr.bf16.mxu0 %v2945_v11  ;;  %v2958_v56 = vld [vmem:[%s3981_s7 + $0x20] sm:$0xff]   ;;  %v3026_v59 = vld [vmem:[#allocation8 + $0x1b0] ss:$24 sps:$4 sm:$0xff]   ;;  %v3036_v1 = vld [vmem:[#allocation8 + $0x214] ss:$24 sps:$4 sm:$0xff]   ;;  %s2539_s10 = sshll.u32 %s4298_s26, 4  ;;  %s4682_s10 = int_to_ptr.vmem [resolvable:$true] %s2539_s10 }
  0xb2   : > { %1568 = vmatpush1.bf16.msra.mxu1 %v2990_v31  ;;  %v3021_v58 = vld [vmem:[#allocation8 + $0x188] ss:$24 sps:$4 sm:$0xff]   ;;  %v3029_v60 = vld [vmem:[#allocation8 + $0x1bc] ss:$24 sps:$4 sm:$0xff]   ;;  %v3027_v63 = vld [vmem:[#allocation8 + $0x1b8] ss:$24 sps:$4 sm:$0xff]  }
  0xb3   : > { %1569 = vmatprep.subr.bf16.mxu1 %v2994_v34  ;;  %v3030_v61 = vld [vmem:[#allocation8 + $0x1e4] ss:$24 sps:$4 sm:$0xff]   ;;  %v3032_v62 = vld [vmem:[#allocation8 + $0x1e0] ss:$24 sps:$4 sm:$0xff]   ;;  %v3038_v4 = vld [vmem:[#allocation8 + $0x210] ss:$24 sps:$4 sm:$0xff]  }
  0xb4   : > { %547 = vmatpush1.bf16.msra.mxu0 %v2947_v12  ;;  %v3035_v2 = vld [vmem:[#allocation8 + $0x1ec] ss:$24 sps:$4 sm:$0xff]   ;;  %v3033_v5 = vld [vmem:[#allocation8 + $0x1e8] ss:$24 sps:$4 sm:$0xff]   ;;  %v3041_v6 = vld [vmem:[#allocation8 + $0x21c] ss:$24 sps:$4 sm:$0xff]  }
  0xb5   : > { %548 = vmatprep.subr.bf16.mxu0 %v2948_v13  ;;  %v2959_v3 = vld [vmem:[%s3981_s7 + $0x28] sm:$0xff]   ;;  %v3044_v8 = vld [vmem:[#allocation8 + $0x240] ss:$24 sps:$4 sm:$0xff]   ;;  %v2960_v12 = vld [vmem:[%s3981_s7 + $0x30] sm:$0xff]   ;;  %s2525_s22 = scalar_lea.sflag [#allocation4], %s3977_s29  ;;  %s3641_s23 = scalar_lea.vmem %s4682_s10, 24576 }
  0xb6   : > { %1570 = vmatpush1.bf16.msra.mxu1 %v2996_v35  ;;  %v3042_v7 = vld [vmem:[#allocation8 + $0x244] ss:$24 sps:$4 sm:$0xff]   ;;  %v3039_v9 = vld [vmem:[#allocation8 + $0x218] ss:$24 sps:$4 sm:$0xff]   ;;  %v3048_v10 = vld [vmem:[#allocation8 + $0x274] ss:$24 sps:$4 sm:$0xff]   ;;  %v350_v35 = vlaneseq  ;;  %p3642_p4 = scmp.ne.s32.totalorder %s4682_s10, %s3641_s23 }
  0xb7   : > { %1571 = vmatprep.subr.bf16.mxu1 %v3000_v37  ;;  %v3047_v11 = vld [vmem:[#allocation8 + $0x24c] ss:$24 sps:$4 sm:$0xff]   ;;  %v3045_v13 = vld [vmem:[#allocation8 + $0x248] ss:$24 sps:$4 sm:$0xff]   ;;  %v3053_v18 = vld [vmem:[#allocation8 + $0x27c] ss:$24 sps:$4 sm:$0xff]  }
  0xb8   : > { %549 = vmatpush1.bf16.msra.mxu0 %v2950_v14  ;;  %v2961_v14 = vld [vmem:[%s3981_s7 + $0x38] sm:$0xff]   ;;  %v2964_v17 = vld [vmem:[%s3981_s7 + $0x50] sm:$0xff]   ;;  %v3057_v25 = vld [vmem:[#allocation8 + $0x2a8] ss:$24 sps:$4 sm:$0xff]   ;;  %p3643_p5 = pnand %p3642_p4, %p3928_p8  ;;  %s3729_s30 = smov [#allocation11]  }
  0xb9   : > { %550 = vmatprep.subr.bf16.mxu0 %v2951_v15  ;;  %v2962_v15 = vld [vmem:[%s3981_s7 + $0x40] sm:$0xff]   ;;  %v2965_v21 = vld [vmem:[%s3981_s7 + $0x58] sm:$0xff]   ;;  %v3062_v28 = vld [vmem:[#allocation8 + $0x2d0] ss:$24 sps:$4 sm:$0xff]   ;;  %s3645_s9 = sshll.u32 %s3729_s30, 4  ;;  %s3646_s9 = int_to_ptr.vmem [resolvable:$false] %s3645_s9 }
  0xba   : > { %1572 = vmatpush1.bf16.msra.mxu1 %v3002_v40  ;;  %v3054_v22 = vld [vmem:[#allocation8 + $0x2a4] ss:$24 sps:$4 sm:$0xff]   ;;  %v3060_v26 = vld [vmem:[#allocation8 + $0x2d4] ss:$24 sps:$4 sm:$0xff]   ;;  %p3644_p7 = pneg %p3643_p5  ;;  %s3647_s13 = scalar_lea.vmem %s3646_s9, 49152 }
  0xbb   : > { %1573 = vmatprep.subr.bf16.mxu1 %v3006_v43  ;;  %v3068_v31 = vld [vmem:[#allocation8 + $0x14] ss:$24 sps:$4 sm:$0xff]   ;;  %p3648_p12 = scmp.lt.s32.totalorder %s4682_s10, %s3646_s9  ;;  %p3649_p2 = scmp.lt.s32.totalorder %s3647_s13, %s3641_s23 }
  0xbc   : > { %551 = vmatpush1.bf16.msra.mxu0 %v2953_v16  ;;  %v2963_v16 = vld [vmem:[%s3981_s7 + $0x48] sm:$0xff]   ;;  %v2969_v34 = vld [vmem:[%s3981_s7 + $0x78] sm:$0xff]  }
  0xbd   : > { %1754 = vmatprep.subr.bf16.mxu0 %v2975_v20  ;;  %v3051_v20 = vld [vmem:[#allocation8 + $0x278] ss:$24 sps:$4 sm:$0xff]   ;;  %p3650_p1 = por %p3649_p2, %p3648_p12 }
  0xbe   : > { %1574 = vmatpush1.bf16.msra.mxu1 %v3008_v44 }
  0xbf   : > { %569 = vmatmul.mubr.bf16.vlgmr.msra.gmra.mrb[0].mxu0 %v2954_v19  ;;  %1575 = vmatprep.subr.bf16.mxu1 %v3012_v46  ;;  %v3050_v19 = vld [vmem:[#allocation8 + $0x270] ss:$24 sps:$4 sm:$0xff]   ;;  %p3651_p13 = pnand %p3650_p1, %p3644_p7 }
  0xc0   : > { %578 = vmatprep.mubr.bf16.mxu0 %v3728_v0  ;;  %1755 = vmatpush1.bf16.msra.mxu0 %v2973_v23  ;;  %v3059_v23 = vld [vmem:[#allocation8 + $0x2ac] ss:$24 sps:$4 sm:$0xff]  }
  0xc1   : > { %1756 = vmatprep.subr.bf16.mxu0 %v2981_v24  ;;  %v3056_v24 = vld [vmem:[#allocation8 + $0x2a0] ss:$24 sps:$4 sm:$0xff]  }
  0xc2   : > { %1576 = vmatpush1.bf16.msra.mxu1 %v3014_v49 }
  0xc3   : > { %1577 = vmatprep.subr.bf16.mxu1 %v3018_v52 }
  0xc4   : > { %1757 = vmatpush1.bf16.msra.mxu0 %v2979_v27  ;;  %v3065_v27 = vld [vmem:[#allocation8 + $0x2dc] ss:$24 sps:$4 sm:$0xff]  }
  0xc5   : > { %1758 = vmatprep.subr.bf16.mxu0 %v2987_v29  ;;  %v3063_v29 = vld [vmem:[#allocation8 + $0x2d8] ss:$24 sps:$4 sm:$0xff]  }
  0xc6   : > { %1578 = vmatpush1.bf16.msra.mxu1 %v3020_v53 }
  0xc7   : > { %579 = vmatmul.mubr.bf16.gmra.mrb[4].mxu0 %v2955_v30  ;;  %1579 = vmatprep.subr.bf16.mxu1 %v3024_v55  ;;  %v2966_v30 = vld [vmem:[%s3981_s7 + $0x60] sm:$0xff]  }
  0xc8   : > { %588 = vmatprep.mubr.bf16.mxu0 %v3728_v0  ;;  %1759 = vmatpush1.bf16.msra.mxu0 %v2985_v32  ;;  %v2967_v32 = vld [vmem:[%s3981_s7 + $0x68] sm:$0xff]  }
  0xc9   : > { %1760 = vmatprep.subr.bf16.mxu0 %v2993_v33  ;;  %v2968_v33 = vld [vmem:[%s3981_s7 + $0x70] sm:$0xff]  }
  0xca   : > { %1580 = vmatpush1.bf16.msra.mxu1 %v3026_v59 }
  0xcb   : > { %1581 = vmatprep.subr.bf16.mxu1 %v3030_v61 }
  0xcc   : > { %1761 = vmatpush1.bf16.msra.mxu0 %v2991_v36  ;;  %v4027_v36 = vshrl.u32 %v350_v35, 7 }
  0xcd   : > { %1762 = vmatprep.subr.bf16.mxu0 %v2999_v38  ;;  %v348_v38 = vld [vmem:[#allocation7] sm:$0x3] }
  0xce   : > { %1582 = vmatpush1.bf16.msra.mxu1 %v3032_v62  ;;  %v352_v37 = vsub.s32 0, %v4027_v36  ;;  %v3066_v62 = vld [vmem:[#allocation8 + $0x10] ss:$24 sps:$4 sm:$0xff]  }
  0xcf   : > { %589 = vmatmul.mubr.bf16.gmra.mrb[8].mxu0 %v2956_v39  ;;  %1583 = vmatprep.subr.bf16.mxu1 %v3036_v1  ;;  %v356_v39 = vsub.s32 1, %v4027_v36 }
  0xd0   : > { %598 = vmatprep.mubr.bf16.mxu0 %v3728_v0  ;;  %1763 = vmatpush1.bf16.msra.mxu0 %v2997_v41  ;;  %v4033_v40 = vrot.slane %v348_v38, %v352_v37 }
  0xd1   : > { %1764 = vmatprep.subr.bf16.mxu0 %v3005_v42  ;;  %v4037_v41 = vrot.slane %v348_v38, %v356_v39 }
  0xd2   : > { %1584 = vmatpush1.bf16.msra.mxu1 %v3038_v4 }
  0xd3   : > { %1585 = vmatprep.subr.bf16.mxu1 %v3042_v7 }
  0xd4   : > { %1765 = vmatpush1.bf16.msra.mxu0 %v3003_v45 }
  0xd5   : > { %1766 = vmatprep.subr.bf16.mxu0 %v3011_v47 }
  0xd6   : > { %1586 = vmatpush1.bf16.msra.mxu1 %v3044_v8 }
  0xd7   : > { %599 = vmatmul.mubr.bf16.gmra.mrb[12].mxu0 %v2957_v48  ;;  %1587 = vmatprep.subr.bf16.mxu1 %v3048_v10 }
  0xd8   : > { %608 = vmatprep.mubr.bf16.mxu0 %v3728_v0  ;;  %1767 = vmatpush1.bf16.msra.mxu0 %v3009_v50 }
  0xd9   : > { %1768 = vmatprep.subr.bf16.mxu0 %v3017_v51 }
  0xda   : > { %1588 = vmatpush1.bf16.msra.mxu1 %v3050_v19 }
  0xdb   : > { %1589 = vmatprep.subr.bf16.mxu1 %v3054_v22 }
  0xdc   : > { %1769 = vmatpush1.bf16.msra.mxu0 %v3015_v54 }
  0xdd   : > { %1770 = vmatprep.subr.bf16.mxu0 %v3023_v57 }
  0xde   : > { %1590 = vmatpush1.bf16.msra.mxu1 %v3056_v24  ;;  %v3077_v24 = vld [vmem:[#allocation8 + $0xa4] ss:$24 sps:$4 sm:$0xff]  }
  0xdf   : > { %609 = vmatmul.mubr.bf16.gmra.mrb[16].mxu0 %v2958_v56  ;;  %1591 = vmatprep.subr.bf16.mxu1 %v3060_v26 }
  0xe0   : > { %618 = vmatprep.mubr.bf16.mxu0 %v3728_v0  ;;  %1771 = vmatpush1.bf16.msra.mxu0 %v3021_v58 }
  0xe1   : > { %1772 = vmatprep.subr.bf16.mxu0 %v3029_v60 }
  0xe2   : > { %1592 = vmatpush1.bf16.msra.mxu1 %v3062_v28 }
  0xe3   : > { %2800 = vmatprep.subr.bf16.mxu1 %v3068_v31 }
  0xe4   : > { %1773 = vmatpush1.bf16.msra.mxu0 %v3027_v63 }
  0xe5   : > { %1774 = vmatprep.subr.bf16.mxu0 %v3035_v2  ;;  %v3071_v2 = vld [vmem:[#allocation8 + $0x44] ss:$24 sps:$4 sm:$0xff]  }
  0xe7   : > { %619 = vmatmul.mubr.bf16.gmra.mrb[20].mxu0 %v2959_v3 }
  0xe8   : > { %628 = vmatprep.mubr.bf16.mxu0 %v3728_v0  ;;  %1775 = vmatpush1.bf16.msra.mxu0 %v3033_v5 }
  0xe9   : > { %1776 = vmatprep.subr.bf16.mxu0 %v3041_v6 }
  0xec   : > { %1777 = vmatpush1.bf16.msra.mxu0 %v3039_v9  ;;  %v3069_v9 = vld [vmem:[#allocation8 + $0x40] ss:$24 sps:$4 sm:$0xff]  }
  0xed   : > { %1778 = vmatprep.subr.bf16.mxu0 %v3047_v11  ;;  %v3074_v11 = vld [vmem:[#allocation8 + $0x74] ss:$24 sps:$4 sm:$0xff]  }
  0xef   : > { %629 = vmatmul.mubr.bf16.gmra.mrb[24].mxu0 %v2960_v12 }
  0xf0   : > { %638 = vmatprep.mubr.bf16.mxu0 %v3728_v0  ;;  %1779 = vmatpush1.bf16.msra.mxu0 %v3045_v13 }
  0xf1   : > { %1780 = vmatprep.subr.bf16.mxu0 %v3053_v18 }
  0xf4   : > { %1781 = vmatpush1.bf16.msra.mxu0 %v3051_v20 }
  0xf5   : > { %1782 = vmatprep.subr.bf16.mxu0 %v3059_v23 }
  0xf7   : > { %639 = vmatmul.mubr.bf16.gmra.mrb[28].mxu0 %v2961_v14 }
  0xf8   : > { %648 = vmatprep.mubr.bf16.mxu0 %v3728_v0  ;;  %1783 = vmatpush1.bf16.msra.mxu0 %v3057_v25 }
  0xf9   : > { %1784 = vmatprep.subr.bf16.mxu0 %v3065_v27 }
  0xfc   : > { %1785 = vmatpush1.bf16.msra.mxu0 %v3063_v29 }
  0xfd   : > { %1947 = vmatprep.subr.bf16.mxu0 %v3068_v31  ;;  %v3075_v31 = vld [vmem:[#allocation8 + $0xa0] ss:$24 sps:$4 sm:$0xff]  }
  0xff   : > { %649 = vmatmul.mubr.bf16.gmra.mrb[32].mxu0 %v2962_v15 }
 0x100   : > { %658 = vmatprep.mubr.bf16.mxu0 %v3728_v0 }
 0x107   : > { %659 = vmatmul.mubr.bf16.gmra.mrb[36].mxu0 %v2963_v16 }
 0x108   : > { %668 = vmatprep.mubr.bf16.mxu0 %v3728_v0 }
 0x10f   : > { %669 = vmatmul.mubr.bf16.gmra.mrb[40].mxu0 %v2964_v17 }
 0x110   : > { %678 = vmatprep.mubr.bf16.mxu0 %v3728_v0 }
 0x117   : > { %679 = vmatmul.mubr.bf16.gmra.mrb[44].mxu0 %v2965_v21  ;;  %v3072_v21 = vld [vmem:[#allocation8 + $0x70] ss:$24 sps:$4 sm:$0xff]  }
 0x118   : > { %688 = vmatprep.mubr.bf16.mxu0 %v3728_v0 }
 0x11f   : > { %689 = vmatmul.mubr.bf16.gmra.mrb[48].mxu0 %v2966_v30 }
 0x120   : > { %698 = vmatprep.mubr.bf16.mxu0 %v3728_v0 }
 0x127   : > { %699 = vmatmul.mubr.bf16.gmra.mrb[52].mxu0 %v2967_v32 }
 0x128   : > { %708 = vmatprep.mubr.bf16.mxu0 %v3728_v0 }
 0x12f   : > { %709 = vmatmul.mubr.bf16.gmra.mrb[56].mxu0 %v2968_v33  ;;  %v3080_v33 = vld [vmem:[#allocation8 + $0xd4] ss:$24 sps:$4 sm:$0xff]  }
 0x130   : > { %718 = vmatprep.mubr.bf16.mxu0 %v3728_v0 }
 0x137   : > { %719 = vmatmul.mubr.bf16.gmra.mrb[60].mxu0 %v2969_v34 }
 0x192   : > { %v570_v42 = vpop.f32.mrb[0].mxu0 }
 0x193   : > { %v571_v0 = vadd.f32 %v570_v42, %v4033_v40  ;;  %v572_v43 = vpop.f32.mrb[1].mxu0 }
 0x194   : > { %v573_v44 = vadd.f32 %v572_v43, %v4037_v41  ;;  %v574_v45 = vpop.f32.mrb[2].mxu0 }
 0x195   : > { %v793_v46 = vmul.f32 0.2, %v571_v0  ;;  %v575_v47 = vadd.f32 %v574_v45, %v4033_v40  ;;  %v576_v48 = vpop.f32.mrb[3].mxu0  ;;  %vm729_vm0 = vcmp.gt.f32.partialorder %v571_v0, 0.0 }
 0x196   : > { %v794_v49 = vmul.f32 0.2, %v573_v44  ;;  %v577_v50 = vadd.f32 %v576_v48, %v4037_v41  ;;  %vm730_vm1 = vcmp.gt.f32.partialorder %v573_v44, 0.0 }
 0x197   : > { %vm731_vm2 = vcmp.gt.f32.partialorder %v575_v47, 0.0  ;;  %v795_v51 = vmul.f32 0.2, %v575_v47  ;;  %v857_v53 = vsel %vm729_vm0, %v571_v0, %v793_v46 }
 0x198   : > { %vm732_vm3 = vcmp.gt.f32.partialorder %v577_v50, 0.0  ;;  %v796_v52 = vmul.f32 0.2, %v577_v50  ;;  %v858_v56 = vsel %vm730_vm1, %v573_v44, %v794_v49 }
 0x199   : > { %v859_v54 = vsel %vm731_vm2, %v575_v47, %v795_v51  ;;  %v3078_v47 = vld [vmem:[#allocation8 + $0xd0] ss:$24 sps:$4 sm:$0xff]  }
 0x19a   : > { %v580_v55 = vpop.f32.mrb[4].mxu0  ;;  %v860_v57 = vsel %vm732_vm3, %v577_v50, %v796_v52  ;;  %v4043_v58 = vpack.c.bf16 %v859_v54, %v857_v53  ;;  %v3083_v50 = vld [vmem:[#allocation8 + $0x104] ss:$24 sps:$4 sm:$0xff]  }
 0x19b   : > { %v581_v59 = vadd.f32 %v580_v55, %v4033_v40  ;;  %v582_v60 = vpop.f32.mrb[5].mxu0  ;;  %v4046_v61 = vpack.c.bf16 %v860_v57, %v858_v56  ;;  %v3081_v57 = vld [vmem:[#allocation8 + $0x100] ss:$24 sps:$4 sm:$0xff]  }
 0x19c   : > { %v583_v63 = vadd.f32 %v582_v60, %v4037_v41  ;;  %v584_v1 = vpop.f32.mrb[6].mxu0  ;;  %v3086_v60 = vld [vmem:[#allocation8 + $0x134] ss:$24 sps:$4 sm:$0xff]  }
 0x19d   : > { %v797_v3 = vmul.f32 0.2, %v581_v59  ;;  %v585_v4 = vadd.f32 %v584_v1, %v4033_v40  ;;  %v586_v5 = vpop.f32.mrb[7].mxu0  ;;  %1593 = vmatprep.mubr.bf16.mxu1 %v4046_v61  ;;  %1786 = vmatprep.mubr.bf16.mxu0 %v4046_v61  ;;  %vm733_vm4 = vcmp.gt.f32.partialorder %v581_v59, 0.0 }
 0x19e   : > { %v798_v6 = vmul.f32 0.2, %v583_v63  ;;  %v587_v7 = vadd.f32 %v586_v5, %v4037_v41  ;;  %1594 = vmatmul.mubr.bf16.vlgmr.msra.gmra.mrb[0].mxu1 %v4043_v58  ;;  %1787 = vmatmul.mubr.bf16.vlgmr.msra.gmra.mrb[64].mxu0 %v4043_v58  ;;  %vm734_vm5 = vcmp.gt.f32.partialorder %v583_v63, 0.0 }
 0x19f   : > { %vm735_vm6 = vcmp.gt.f32.partialorder %v585_v4, 0.0  ;;  %v799_v8 = vmul.f32 0.2, %v585_v4  ;;  %2816 = vmatpush1.bf16.msra.mxu1 %v3066_v62  ;;  %1948 = vmatpush1.bf16.msra.mxu0 %v3066_v62  ;;  %v861_v12 = vsel %vm733_vm4, %v581_v59, %v797_v3 }
 0x1a0   : > { %vm736_vm7 = vcmp.gt.f32.partialorder %v587_v7, 0.0  ;;  %v800_v10 = vmul.f32 0.2, %v587_v7  ;;  %2801 = vmatprep.subr.bf16.mxu1 %v3071_v2  ;;  %1949 = vmatprep.subr.bf16.mxu0 %v3071_v2  ;;  %v862_v15 = vsel %vm734_vm5, %v583_v63, %v798_v6 }
 0x1a1   : > { %v863_v13 = vsel %vm735_vm6, %v585_v4, %v799_v8  ;;  %v3084_v8 = vld [vmem:[#allocation8 + $0x130] ss:$24 sps:$4 sm:$0xff]  }
 0x1a2   : > { %v590_v14 = vpop.f32.mrb[8].mxu0  ;;  %v864_v16 = vsel %vm736_vm7, %v587_v7, %v800_v10  ;;  %v4056_v17 = vpack.c.bf16 %v863_v13, %v861_v12 }
 0x1a3   : > { %v591_v18 = vadd.f32 %v590_v14, %v4033_v40  ;;  %v592_v19 = vpop.f32.mrb[9].mxu0  ;;  %v4059_v20 = vpack.c.bf16 %v864_v16, %v862_v15  ;;  %2817 = vmatpush1.bf16.msra.mxu1 %v3069_v9  ;;  %1950 = vmatpush1.bf16.msra.mxu0 %v3069_v9 }
 0x1a4   : > { %v593_v22 = vadd.f32 %v592_v19, %v4037_v41  ;;  %v594_v23 = vpop.f32.mrb[10].mxu0  ;;  %2802 = vmatprep.subr.bf16.mxu1 %v3074_v11  ;;  %1951 = vmatprep.subr.bf16.mxu0 %v3074_v11  ;;  %v3089_v11 = vld [vmem:[#allocation8 + $0x164] ss:$24 sps:$4 sm:$0xff]   ;;  %v3087_v19 = vld [vmem:[#allocation8 + $0x160] ss:$24 sps:$4 sm:$0xff]  }
 0x1a5   : > { %v801_v25 = vmul.f32 0.2, %v591_v18  ;;  %v595_v26 = vadd.f32 %v594_v23, %v4033_v40  ;;  %v596_v27 = vpop.f32.mrb[11].mxu0  ;;  %1603 = vmatprep.mubr.bf16.mxu1 %v4059_v20  ;;  %1796 = vmatprep.mubr.bf16.mxu0 %v4059_v20  ;;  %vm737_vm8 = vcmp.gt.f32.partialorder %v591_v18, 0.0 }
 0x1a6   : > { %v802_v28 = vmul.f32 0.2, %v593_v22  ;;  %v597_v29 = vadd.f32 %v596_v27, %v4037_v41  ;;  %1604 = vmatmul.mubr.bf16.gmra.mrb[4].mxu1 %v4056_v17  ;;  %1797 = vmatmul.mubr.bf16.gmra.mrb[68].mxu0 %v4056_v17  ;;  %vm738_vm9 = vcmp.gt.f32.partialorder %v593_v22, 0.0 }
 0x1a7   : > { %vm739_vm10 = vcmp.gt.f32.partialorder %v595_v26, 0.0  ;;  %v803_v30 = vmul.f32 0.2, %v595_v26  ;;  %2818 = vmatpush1.bf16.msra.mxu1 %v3072_v21  ;;  %1952 = vmatpush1.bf16.msra.mxu0 %v3072_v21  ;;  %v865_v34 = vsel %vm737_vm8, %v591_v18, %v801_v25 }
 0x1a8   : > { %vm740_vm11 = vcmp.gt.f32.partialorder %v597_v29, 0.0  ;;  %v804_v32 = vmul.f32 0.2, %v597_v29  ;;  %2803 = vmatprep.subr.bf16.mxu1 %v3077_v24  ;;  %1953 = vmatprep.subr.bf16.mxu0 %v3077_v24  ;;  %v866_v42 = vsel %vm738_vm9, %v593_v22, %v802_v28  ;;  %v3092_v22 = vld [vmem:[#allocation8 + $0x194] ss:$24 sps:$4 sm:$0xff]  }
 0x1a9   : > { %v867_v35 = vsel %vm739_vm10, %v595_v26, %v803_v30 }
 0x1aa   : > { %v600_v38 = vpop.f32.mrb[12].mxu0  ;;  %v868_v0 = vsel %vm740_vm11, %v597_v29, %v804_v32  ;;  %v4069_v43 = vpack.c.bf16 %v867_v35, %v865_v34  ;;  %v3090_v32 = vld [vmem:[#allocation8 + $0x190] ss:$24 sps:$4 sm:$0xff]   ;;  %v3095_v35 = vld [vmem:[#allocation8 + $0x1c4] ss:$24 sps:$4 sm:$0xff]  }
 0x1ab   : > { %v601_v44 = vadd.f32 %v600_v38, %v4033_v40  ;;  %v602_v45 = vpop.f32.mrb[13].mxu0  ;;  %v4072_v46 = vpack.c.bf16 %v868_v0, %v866_v42  ;;  %2819 = vmatpush1.bf16.msra.mxu1 %v3075_v31  ;;  %1954 = vmatpush1.bf16.msra.mxu0 %v3075_v31 }
 0x1ac   : > { %v603_v48 = vadd.f32 %v602_v45, %v4037_v41  ;;  %v604_v49 = vpop.f32.mrb[14].mxu0  ;;  %2804 = vmatprep.subr.bf16.mxu1 %v3080_v33  ;;  %1955 = vmatprep.subr.bf16.mxu0 %v3080_v33 }
 0x1ad   : > { %v805_v51 = vmul.f32 0.2, %v601_v44  ;;  %v605_v52 = vadd.f32 %v604_v49, %v4033_v40  ;;  %v606_v53 = vpop.f32.mrb[15].mxu0  ;;  %1613 = vmatprep.mubr.bf16.mxu1 %v4072_v46  ;;  %1806 = vmatprep.mubr.bf16.mxu0 %v4072_v46  ;;  %vm741_vm12 = vcmp.gt.f32.partialorder %v601_v44, 0.0 }
 0x1ae   : > { %v806_v54 = vmul.f32 0.2, %v603_v48  ;;  %v607_v55 = vadd.f32 %v606_v53, %v4037_v41  ;;  %1614 = vmatmul.mubr.bf16.gmra.mrb[8].mxu1 %v4069_v43  ;;  %1807 = vmatmul.mubr.bf16.gmra.mrb[72].mxu0 %v4069_v43  ;;  %vm742_vm13 = vcmp.gt.f32.partialorder %v603_v48, 0.0 }
 0x1af   : > { %vm743_vm14 = vcmp.gt.f32.partialorder %v605_v52, 0.0  ;;  %v807_v56 = vmul.f32 0.2, %v605_v52  ;;  %2820 = vmatpush1.bf16.msra.mxu1 %v3078_v47  ;;  %1956 = vmatpush1.bf16.msra.mxu0 %v3078_v47  ;;  %v869_v62 = vsel %vm741_vm12, %v601_v44, %v805_v51 }
 0x1b0   : > { %vm744_vm15 = vcmp.gt.f32.partialorder %v607_v55, 0.0  ;;  %v808_v59 = vmul.f32 0.2, %v607_v55  ;;  %2805 = vmatprep.subr.bf16.mxu1 %v3083_v50  ;;  %1957 = vmatprep.subr.bf16.mxu0 %v3083_v50  ;;  %v870_v2 = vsel %vm742_vm13, %v603_v48, %v806_v54  ;;  %v3093_v48 = vld [vmem:[#allocation8 + $0x1c0] ss:$24 sps:$4 sm:$0xff]  }
 0x1b1   : > { %v871_v63 = vsel %vm743_vm14, %v605_v52, %v807_v56  ;;  %v3098_v50 = vld [vmem:[#allocation8 + $0x1f4] ss:$24 sps:$4 sm:$0xff]  }
 0x1b2   : > { %v610_v1 = vpop.f32.mrb[16].mxu0  ;;  %v872_v3 = vsel %vm744_vm15, %v607_v55, %v808_v59  ;;  %v4082_v4 = vpack.c.bf16 %v871_v63, %v869_v62  ;;  %v3096_v62 = vld [vmem:[#allocation8 + $0x1f0] ss:$24 sps:$4 sm:$0xff]  }
 0x1b3   : > { %v611_v5 = vadd.f32 %v610_v1, %v4033_v40  ;;  %v612_v6 = vpop.f32.mrb[17].mxu0  ;;  %v4085_v7 = vpack.c.bf16 %v872_v3, %v870_v2  ;;  %2821 = vmatpush1.bf16.msra.mxu1 %v3081_v57  ;;  %1958 = vmatpush1.bf16.msra.mxu0 %v3081_v57  ;;  %v3101_v2 = vld [vmem:[#allocation8 + $0x224] ss:$24 sps:$4 sm:$0xff]  }
 0x1b4   : > { %v613_v9 = vadd.f32 %v612_v6, %v4037_v41  ;;  %v614_v10 = vpop.f32.mrb[18].mxu0  ;;  %2806 = vmatprep.subr.bf16.mxu1 %v3086_v60  ;;  %1959 = vmatprep.subr.bf16.mxu0 %v3086_v60 }
 0x1b5   : > { %v809_v12 = vmul.f32 0.2, %v611_v5  ;;  %v615_v13 = vadd.f32 %v614_v10, %v4033_v40  ;;  %v616_v14 = vpop.f32.mrb[19].mxu0  ;;  %1623 = vmatprep.mubr.bf16.mxu1 %v4085_v7  ;;  %1816 = vmatprep.mubr.bf16.mxu0 %v4085_v7  ;;  %vm745_vm0 = vcmp.gt.f32.partialorder %v611_v5, 0.0 }
 0x1b6   : > { %v810_v15 = vmul.f32 0.2, %v613_v9  ;;  %v617_v16 = vadd.f32 %v616_v14, %v4037_v41  ;;  %1624 = vmatmul.mubr.bf16.gmra.mrb[12].mxu1 %v4082_v4  ;;  %1817 = vmatmul.mubr.bf16.gmra.mrb[76].mxu0 %v4082_v4  ;;  %vm746_vm1 = vcmp.gt.f32.partialorder %v613_v9, 0.0 }
 0x1b7   : > { %vm747_vm2 = vcmp.gt.f32.partialorder %v615_v13, 0.0  ;;  %v811_v18 = vmul.f32 0.2, %v615_v13  ;;  %2822 = vmatpush1.bf16.msra.mxu1 %v3084_v8  ;;  %1960 = vmatpush1.bf16.msra.mxu0 %v3084_v8  ;;  %v873_v23 = vsel %vm745_vm0, %v611_v5, %v809_v12 }
 0x1b8   : > { %vm748_vm3 = vcmp.gt.f32.partialorder %v617_v16, 0.0  ;;  %v812_v21 = vmul.f32 0.2, %v617_v16  ;;  %2807 = vmatprep.subr.bf16.mxu1 %v3089_v11  ;;  %1961 = vmatprep.subr.bf16.mxu0 %v3089_v11  ;;  %v874_v26 = vsel %vm746_vm1, %v613_v9, %v810_v15  ;;  %v3099_v11 = vld [vmem:[#allocation8 + $0x220] ss:$24 sps:$4 sm:$0xff]  }
 0x1b9   : > { %v875_v24 = vsel %vm747_vm2, %v615_v13, %v811_v18  ;;  %v3104_v13 = vld [vmem:[#allocation8 + $0x254] ss:$24 sps:$4 sm:$0xff]  }
 0x1ba   : > { %v620_v25 = vpop.f32.mrb[20].mxu0  ;;  %v876_v27 = vsel %vm748_vm3, %v617_v16, %v812_v21  ;;  %v4095_v28 = vpack.c.bf16 %v875_v24, %v873_v23 }
 0x1bb   : > { %v621_v29 = vadd.f32 %v620_v25, %v4033_v40  ;;  %v622_v30 = vpop.f32.mrb[21].mxu0  ;;  %v4098_v31 = vpack.c.bf16 %v876_v27, %v874_v26  ;;  %2823 = vmatpush1.bf16.msra.mxu1 %v3087_v19  ;;  %1962 = vmatpush1.bf16.msra.mxu0 %v3087_v19  ;;  %v3102_v25 = vld [vmem:[#allocation8 + $0x250] ss:$24 sps:$4 sm:$0xff]  }
 0x1bc   : > { %v623_v33 = vadd.f32 %v622_v30, %v4037_v41  ;;  %v624_v34 = vpop.f32.mrb[22].mxu0  ;;  %2808 = vmatprep.subr.bf16.mxu1 %v3092_v22  ;;  %1963 = vmatprep.subr.bf16.mxu0 %v3092_v22 }
 0x1bd   : > { %v813_v38 = vmul.f32 0.2, %v621_v29  ;;  %v625_v42 = vadd.f32 %v624_v34, %v4033_v40  ;;  %v626_v0 = vpop.f32.mrb[23].mxu0  ;;  %1633 = vmatprep.mubr.bf16.mxu1 %v4098_v31  ;;  %1826 = vmatprep.mubr.bf16.mxu0 %v4098_v31  ;;  %vm749_vm4 = vcmp.gt.f32.partialorder %v621_v29, 0.0 }
 0x1be   : > { %v814_v44 = vmul.f32 0.2, %v623_v33  ;;  %v627_v45 = vadd.f32 %v626_v0, %v4037_v41  ;;  %1634 = vmatmul.mubr.bf16.gmra.mrb[16].mxu1 %v4095_v28  ;;  %1827 = vmatmul.mubr.bf16.gmra.mrb[80].mxu0 %v4095_v28  ;;  %vm750_vm5 = vcmp.gt.f32.partialorder %v623_v33, 0.0 }
 0x1bf   : > { %vm751_vm6 = vcmp.gt.f32.partialorder %v625_v42, 0.0  ;;  %v815_v47 = vmul.f32 0.2, %v625_v42  ;;  %2824 = vmatpush1.bf16.msra.mxu1 %v3090_v32  ;;  %1964 = vmatpush1.bf16.msra.mxu0 %v3090_v32  ;;  %v877_v51 = vsel %vm749_vm4, %v621_v29, %v813_v38  ;;  %v3107_v29 = vld [vmem:[#allocation8 + $0x284] ss:$24 sps:$4 sm:$0xff]  }
 0x1c0   : > { %vm752_vm7 = vcmp.gt.f32.partialorder %v627_v45, 0.0  ;;  %v816_v49 = vmul.f32 0.2, %v627_v45  ;;  %2809 = vmatprep.subr.bf16.mxu1 %v3095_v35  ;;  %1965 = vmatprep.subr.bf16.mxu0 %v3095_v35  ;;  %v878_v54 = vsel %vm750_vm5, %v623_v33, %v814_v44  ;;  %v3110_v44 = vld [vmem:[#allocation8 + $0x2b4] ss:$24 sps:$4 sm:$0xff]  }
 0x1c1   : > { %v879_v52 = vsel %vm751_vm6, %v625_v42, %v815_v47  ;;  %v3105_v42 = vld [vmem:[#allocation8 + $0x280] ss:$24 sps:$4 sm:$0xff]  }
 0x1c2   : > { %v630_v53 = vpop.f32.mrb[24].mxu0  ;;  %v880_v55 = vsel %vm752_vm7, %v627_v45, %v816_v49  ;;  %v4108_v56 = vpack.c.bf16 %v879_v52, %v877_v51 }
 0x1c3   : > { %v631_v57 = vadd.f32 %v630_v53, %v4033_v40  ;;  %v632_v59 = vpop.f32.mrb[25].mxu0  ;;  %v4111_v60 = vpack.c.bf16 %v880_v55, %v878_v54  ;;  %2825 = vmatpush1.bf16.msra.mxu1 %v3093_v48  ;;  %1966 = vmatpush1.bf16.msra.mxu0 %v3093_v48  ;;  %v3108_v55 = vld [vmem:[#allocation8 + $0x2b0] ss:$24 sps:$4 sm:$0xff]  }
 0x1c4   : > { %v633_v63 = vadd.f32 %v632_v59, %v4037_v41  ;;  %v634_v1 = vpop.f32.mrb[26].mxu0  ;;  %2810 = vmatprep.subr.bf16.mxu1 %v3098_v50  ;;  %1967 = vmatprep.subr.bf16.mxu0 %v3098_v50 }
 0x1c5   : > { %v817_v3 = vmul.f32 0.2, %v631_v57  ;;  %v635_v5 = vadd.f32 %v634_v1, %v4033_v40  ;;  %v636_v6 = vpop.f32.mrb[27].mxu0  ;;  %1643 = vmatprep.mubr.bf16.mxu1 %v4111_v60  ;;  %1836 = vmatprep.mubr.bf16.mxu0 %v4111_v60  ;;  %vm753_vm8 = vcmp.gt.f32.partialorder %v631_v57, 0.0 }
 0x1c6   : > { %v818_v8 = vmul.f32 0.2, %v633_v63  ;;  %v637_v9 = vadd.f32 %v636_v6, %v4037_v41  ;;  %1644 = vmatmul.mubr.bf16.gmra.mrb[20].mxu1 %v4108_v56  ;;  %1837 = vmatmul.mubr.bf16.gmra.mrb[84].mxu0 %v4108_v56  ;;  %vm754_vm9 = vcmp.gt.f32.partialorder %v633_v63, 0.0 }
 0x1c7   : > { %vm755_vm10 = vcmp.gt.f32.partialorder %v635_v5, 0.0  ;;  %v819_v10 = vmul.f32 0.2, %v635_v5  ;;  %2826 = vmatpush1.bf16.msra.mxu1 %v3096_v62  ;;  %1968 = vmatpush1.bf16.msra.mxu0 %v3096_v62  ;;  %v881_v14 = vsel %vm753_vm8, %v631_v57, %v817_v3  ;;  %v3113_v62 = vld [vmem:[#allocation8 + $0x2e4] ss:$24 sps:$4 sm:$0xff]  }
 0x1c8   : > { %vm756_vm11 = vcmp.gt.f32.partialorder %v637_v9, 0.0  ;;  %v820_v12 = vmul.f32 0.2, %v637_v9  ;;  %2811 = vmatprep.subr.bf16.mxu1 %v3101_v2  ;;  %1969 = vmatprep.subr.bf16.mxu0 %v3101_v2  ;;  %v882_v18 = vsel %vm754_vm9, %v633_v63, %v818_v8  ;;  %v3111_v8 = vld [vmem:[#allocation8 + $0x2e0] ss:$24 sps:$4 sm:$0xff]  }
 0x1c9   : > { %v883_v15 = vsel %vm755_vm10, %v635_v5, %v819_v10 }
 0x1ca   : > { %v640_v16 = vpop.f32.mrb[28].mxu0  ;;  %v884_v19 = vsel %vm756_vm11, %v637_v9, %v820_v12  ;;  %v4121_v21 = vpack.c.bf16 %v883_v15, %v881_v14 }
 0x1cb   : > { %v641_v22 = vadd.f32 %v640_v16, %v4033_v40  ;;  %v642_v23 = vpop.f32.mrb[29].mxu0  ;;  %v4124_v24 = vpack.c.bf16 %v884_v19, %v882_v18  ;;  %2827 = vmatpush1.bf16.msra.mxu1 %v3099_v11  ;;  %1970 = vmatpush1.bf16.msra.mxu0 %v3099_v11 }
 0x1cc   : > { %v643_v26 = vadd.f32 %v642_v23, %v4037_v41  ;;  %v644_v27 = vpop.f32.mrb[30].mxu0  ;;  %2812 = vmatprep.subr.bf16.mxu1 %v3104_v13  ;;  %1971 = vmatprep.subr.bf16.mxu0 %v3104_v13 }
 0x1cd   : > { %v821_v30 = vmul.f32 0.2, %v641_v22  ;;  %v645_v32 = vadd.f32 %v644_v27, %v4033_v40  ;;  %v646_v33 = vpop.f32.mrb[31].mxu0  ;;  %1653 = vmatprep.mubr.bf16.mxu1 %v4124_v24  ;;  %1846 = vmatprep.mubr.bf16.mxu0 %v4124_v24  ;;  %vm757_vm12 = vcmp.gt.f32.partialorder %v641_v22, 0.0 }
 0x1ce   : > { %v822_v34 = vmul.f32 0.2, %v643_v26  ;;  %v647_v35 = vadd.f32 %v646_v33, %v4037_v41  ;;  %1654 = vmatmul.mubr.bf16.gmra.mrb[24].mxu1 %v4121_v21  ;;  %1847 = vmatmul.mubr.bf16.gmra.mrb[88].mxu0 %v4121_v21  ;;  %vm758_vm13 = vcmp.gt.f32.partialorder %v643_v26, 0.0 }
 0x1cf   : > { %vm759_vm14 = vcmp.gt.f32.partialorder %v645_v32, 0.0  ;;  %v823_v38 = vmul.f32 0.2, %v645_v32  ;;  %2828 = vmatpush1.bf16.msra.mxu1 %v3102_v25  ;;  %1972 = vmatpush1.bf16.msra.mxu0 %v3102_v25  ;;  %v885_v45 = vsel %vm757_vm12, %v641_v22, %v821_v30 }
 0x1d0   : > { %vm760_vm15 = vcmp.gt.f32.partialorder %v647_v35, 0.0  ;;  %v824_v0 = vmul.f32 0.2, %v647_v35  ;;  %2813 = vmatprep.subr.bf16.mxu1 %v3107_v29  ;;  %1973 = vmatprep.subr.bf16.mxu0 %v3107_v29  ;;  %v886_v49 = vsel %vm758_vm13, %v643_v26, %v822_v34 }
 0x1d1   : > { %v887_v47 = vsel %vm759_vm14, %v645_v32, %v823_v38 }
 0x1d2   : > { %v650_v48 = vpop.f32.mrb[32].mxu0  ;;  %v888_v50 = vsel %vm760_vm15, %v647_v35, %v824_v0  ;;  %v4134_v51 = vpack.c.bf16 %v887_v47, %v885_v45 }
 0x1d3   : > { %v651_v52 = vadd.f32 %v650_v48, %v4033_v40  ;;  %v652_v53 = vpop.f32.mrb[33].mxu0  ;;  %v4137_v54 = vpack.c.bf16 %v888_v50, %v886_v49  ;;  %2829 = vmatpush1.bf16.msra.mxu1 %v3105_v42  ;;  %1974 = vmatpush1.bf16.msra.mxu0 %v3105_v42 }
 0x1d4   : > { %v653_v57 = vadd.f32 %v652_v53, %v4037_v41  ;;  %v654_v59 = vpop.f32.mrb[34].mxu0  ;;  %2814 = vmatprep.subr.bf16.mxu1 %v3110_v44  ;;  %1975 = vmatprep.subr.bf16.mxu0 %v3110_v44 }
 0x1d5   : > { %v825_v63 = vmul.f32 0.2, %v651_v52  ;;  %v655_v1 = vadd.f32 %v654_v59, %v4033_v40  ;;  %v656_v2 = vpop.f32.mrb[35].mxu0  ;;  %1663 = vmatprep.mubr.bf16.mxu1 %v4137_v54  ;;  %1856 = vmatprep.mubr.bf16.mxu0 %v4137_v54  ;;  %vm761_vm0 = vcmp.gt.f32.partialorder %v651_v52, 0.0 }
 0x1d6   : > { %v826_v3 = vmul.f32 0.2, %v653_v57  ;;  %v657_v5 = vadd.f32 %v656_v2, %v4037_v41  ;;  %1664 = vmatmul.mubr.bf16.gmra.mrb[28].mxu1 %v4134_v51  ;;  %1857 = vmatmul.mubr.bf16.gmra.mrb[92].mxu0 %v4134_v51  ;;  %vm762_vm1 = vcmp.gt.f32.partialorder %v653_v57, 0.0 }
 0x1d7   : > { %vm763_vm2 = vcmp.gt.f32.partialorder %v655_v1, 0.0  ;;  %v827_v6 = vmul.f32 0.2, %v655_v1  ;;  %2830 = vmatpush1.bf16.msra.mxu1 %v3108_v55  ;;  %1976 = vmatpush1.bf16.msra.mxu0 %v3108_v55  ;;  %v889_v10 = vsel %vm761_vm0, %v651_v52, %v825_v63 }
 0x1d8   : > { %vm764_vm3 = vcmp.gt.f32.partialorder %v657_v5, 0.0  ;;  %v828_v9 = vmul.f32 0.2, %v657_v5  ;;  %2815 = vmatprep.subr.bf16.mxu1 %v3113_v62  ;;  %1977 = vmatprep.subr.bf16.mxu0 %v3113_v62  ;;  %v890_v13 = vsel %vm762_vm1, %v653_v57, %v826_v3 }
 0x1d9   : > { %v891_v11 = vsel %vm763_vm2, %v655_v1, %v827_v6 }
 0x1da   : > { %v660_v12 = vpop.f32.mrb[36].mxu0  ;;  %v892_v14 = vsel %vm764_vm3, %v657_v5, %v828_v9  ;;  %v4146_v15 = vpack.c.bf16 %v891_v11, %v889_v10 }
 0x1db   : > { %v661_v16 = vadd.f32 %v660_v12, %v4033_v40  ;;  %v662_v18 = vpop.f32.mrb[37].mxu0  ;;  %v4149_v19 = vpack.c.bf16 %v892_v14, %v890_v13  ;;  %2831 = vmatpush1.bf16.msra.mxu1 %v3111_v8  ;;  %1978 = vmatpush1.bf16.msra.mxu0 %v3111_v8 }
 0x1dc   : > { %v663_v22 = vadd.f32 %v662_v18, %v4037_v41  ;;  %v664_v23 = vpop.f32.mrb[38].mxu0 }
 0x1dd   : > { %v829_v25 = vmul.f32 0.2, %v661_v16  ;;  %v665_v26 = vadd.f32 %v664_v23, %v4033_v40  ;;  %v666_v27 = vpop.f32.mrb[39].mxu0  ;;  %1673 = vmatprep.mubr.bf16.mxu1 %v4149_v19  ;;  %1866 = vmatprep.mubr.bf16.mxu0 %v4149_v19  ;;  %vm765_vm4 = vcmp.gt.f32.partialorder %v661_v16, 0.0 }
 0x1de   : > { %v830_v29 = vmul.f32 0.2, %v663_v22  ;;  %v667_v30 = vadd.f32 %v666_v27, %v4037_v41  ;;  %1674 = vmatmul.mubr.bf16.gmra.mrb[32].mxu1 %v4146_v15  ;;  %1867 = vmatmul.mubr.bf16.gmra.mrb[96].mxu0 %v4146_v15  ;;  %vm766_vm5 = vcmp.gt.f32.partialorder %v663_v22, 0.0 }
 0x1df   : > { %vm767_vm6 = vcmp.gt.f32.partialorder %v665_v26, 0.0  ;;  %v831_v32 = vmul.f32 0.2, %v665_v26  ;;  %v893_v34 = vsel %vm765_vm4, %v661_v16, %v829_v25 }
 0x1e0   : > { %vm768_vm7 = vcmp.gt.f32.partialorder %v667_v30, 0.0  ;;  %v832_v33 = vmul.f32 0.2, %v667_v30  ;;  %v894_v42 = vsel %vm766_vm5, %v663_v22, %v830_v29 }
 0x1e1   : > { %v895_v35 = vsel %vm767_vm6, %v665_v26, %v831_v32 }
 0x1e2   : > { %v670_v38 = vpop.f32.mrb[40].mxu0  ;;  %v896_v0 = vsel %vm768_vm7, %v667_v30, %v832_v33  ;;  %v4158_v44 = vpack.c.bf16 %v895_v35, %v893_v34 }
 0x1e3   : > { %v671_v45 = vadd.f32 %v670_v38, %v4033_v40  ;;  %v672_v47 = vpop.f32.mrb[41].mxu0  ;;  %v4161_v48 = vpack.c.bf16 %v896_v0, %v894_v42 }
 0x1e4   : > { %v673_v49 = vadd.f32 %v672_v47, %v4037_v41  ;;  %v674_v50 = vpop.f32.mrb[42].mxu0 }
 0x1e5   : > { %v833_v52 = vmul.f32 0.2, %v671_v45  ;;  %v675_v53 = vadd.f32 %v674_v50, %v4033_v40  ;;  %v676_v55 = vpop.f32.mrb[43].mxu0  ;;  %1683 = vmatprep.mubr.bf16.mxu1 %v4161_v48  ;;  %1876 = vmatprep.mubr.bf16.mxu0 %v4161_v48  ;;  %vm769_vm8 = vcmp.gt.f32.partialorder %v671_v45, 0.0 }
 0x1e6   : > { %v834_v57 = vmul.f32 0.2, %v673_v49  ;;  %v677_v59 = vadd.f32 %v676_v55, %v4037_v41  ;;  %1684 = vmatmul.mubr.bf16.gmra.mrb[36].mxu1 %v4158_v44  ;;  %1877 = vmatmul.mubr.bf16.gmra.mrb[100].mxu0 %v4158_v44  ;;  %vm770_vm9 = vcmp.gt.f32.partialorder %v673_v49, 0.0 }
 0x1e7   : > { %vm771_vm10 = vcmp.gt.f32.partialorder %v675_v53, 0.0  ;;  %v835_v62 = vmul.f32 0.2, %v675_v53  ;;  %v897_v1 = vsel %vm769_vm8, %v671_v45, %v833_v52 }
 0x1e8   : > { %vm772_vm11 = vcmp.gt.f32.partialorder %v677_v59, 0.0  ;;  %v836_v63 = vmul.f32 0.2, %v677_v59  ;;  %v898_v5 = vsel %vm770_vm9, %v673_v49, %v834_v57 }
 0x1e9   : > { %v899_v2 = vsel %vm771_vm10, %v675_v53, %v835_v62 }
 0x1ea   : > { %v680_v3 = vpop.f32.mrb[44].mxu0  ;;  %v900_v6 = vsel %vm772_vm11, %v677_v59, %v836_v63  ;;  %v4170_v8 = vpack.c.bf16 %v899_v2, %v897_v1 }
 0x1eb   : > { %v681_v9 = vadd.f32 %v680_v3, %v4033_v40  ;;  %v682_v10 = vpop.f32.mrb[45].mxu0  ;;  %v4173_v11 = vpack.c.bf16 %v900_v6, %v898_v5 }
 0x1ec   : > { %v683_v12 = vadd.f32 %v682_v10, %v4037_v41  ;;  %v684_v13 = vpop.f32.mrb[46].mxu0 }
 0x1ed   : > { %v837_v14 = vmul.f32 0.2, %v681_v9  ;;  %v685_v16 = vadd.f32 %v684_v13, %v4033_v40  ;;  %v686_v18 = vpop.f32.mrb[47].mxu0  ;;  %1693 = vmatprep.mubr.bf16.mxu1 %v4173_v11  ;;  %1886 = vmatprep.mubr.bf16.mxu0 %v4173_v11  ;;  %vm773_vm12 = vcmp.gt.f32.partialorder %v681_v9, 0.0 }
 0x1ee   : > { %v838_v22 = vmul.f32 0.2, %v683_v12  ;;  %v687_v23 = vadd.f32 %v686_v18, %v4037_v41  ;;  %1694 = vmatmul.mubr.bf16.gmra.mrb[40].mxu1 %v4170_v8  ;;  %1887 = vmatmul.mubr.bf16.gmra.mrb[104].mxu0 %v4170_v8  ;;  %vm774_vm13 = vcmp.gt.f32.partialorder %v683_v12, 0.0 }
 0x1ef   : > { %vm775_vm14 = vcmp.gt.f32.partialorder %v685_v16, 0.0  ;;  %v839_v25 = vmul.f32 0.2, %v685_v16  ;;  %v901_v27 = vsel %vm773_vm12, %v681_v9, %v837_v14 }
 0x1f0   : > { %vm776_vm15 = vcmp.gt.f32.partialorder %v687_v23, 0.0  ;;  %v840_v26 = vmul.f32 0.2, %v687_v23  ;;  %v902_v32 = vsel %vm774_vm13, %v683_v12, %v838_v22 }
 0x1f1   : > { %v903_v29 = vsel %vm775_vm14, %v685_v16, %v839_v25 }
 0x1f2   : > { %v690_v30 = vpop.f32.mrb[48].mxu0  ;;  %v904_v33 = vsel %vm776_vm15, %v687_v23, %v840_v26  ;;  %v4182_v34 = vpack.c.bf16 %v903_v29, %v901_v27 }
 0x1f3   : > { %v691_v35 = vadd.f32 %v690_v30, %v4033_v40  ;;  %v692_v38 = vpop.f32.mrb[49].mxu0  ;;  %v4185_v42 = vpack.c.bf16 %v904_v33, %v902_v32 }
 0x1f4   : > { %v693_v0 = vadd.f32 %v692_v38, %v4037_v41  ;;  %v694_v45 = vpop.f32.mrb[50].mxu0 }
 0x1f5   : > { %v841_v47 = vmul.f32 0.2, %v691_v35  ;;  %v695_v49 = vadd.f32 %v694_v45, %v4033_v40  ;;  %v696_v50 = vpop.f32.mrb[51].mxu0  ;;  %1703 = vmatprep.mubr.bf16.mxu1 %v4185_v42  ;;  %1896 = vmatprep.mubr.bf16.mxu0 %v4185_v42  ;;  %vm777_vm0 = vcmp.gt.f32.partialorder %v691_v35, 0.0 }
 0x1f6   : > { %v842_v52 = vmul.f32 0.2, %v693_v0  ;;  %v697_v53 = vadd.f32 %v696_v50, %v4037_v41  ;;  %1704 = vmatmul.mubr.bf16.gmra.mrb[44].mxu1 %v4182_v34  ;;  %1897 = vmatmul.mubr.bf16.gmra.mrb[108].mxu0 %v4182_v34  ;;  %vm778_vm1 = vcmp.gt.f32.partialorder %v693_v0, 0.0 }
 0x1f7   : > { %vm779_vm2 = vcmp.gt.f32.partialorder %v695_v49, 0.0  ;;  %v843_v55 = vmul.f32 0.2, %v695_v49  ;;  %v905_v59 = vsel %vm777_vm0, %v691_v35, %v841_v47 }
 0x1f8   : > { %vm780_vm3 = vcmp.gt.f32.partialorder %v697_v53, 0.0  ;;  %v844_v57 = vmul.f32 0.2, %v697_v53  ;;  %v906_v1 = vsel %vm778_vm1, %v693_v0, %v842_v52 }
 0x1f9   : > { %v907_v62 = vsel %vm779_vm2, %v695_v49, %v843_v55 }
 0x1fa   : > { %v700_v63 = vpop.f32.mrb[52].mxu0  ;;  %v908_v2 = vsel %vm780_vm3, %v697_v53, %v844_v57  ;;  %v4194_v3 = vpack.c.bf16 %v907_v62, %v905_v59 }
 0x1fb   : > { %v701_v5 = vadd.f32 %v700_v63, %v4033_v40  ;;  %v702_v6 = vpop.f32.mrb[53].mxu0  ;;  %v4197_v9 = vpack.c.bf16 %v908_v2, %v906_v1 }
 0x1fc   : > { %v703_v10 = vadd.f32 %v702_v6, %v4037_v41  ;;  %v704_v12 = vpop.f32.mrb[54].mxu0 }
 0x1fd   : > { %v845_v13 = vmul.f32 0.2, %v701_v5  ;;  %v705_v14 = vadd.f32 %v704_v12, %v4033_v40  ;;  %v706_v16 = vpop.f32.mrb[55].mxu0  ;;  %1713 = vmatprep.mubr.bf16.mxu1 %v4197_v9  ;;  %1906 = vmatprep.mubr.bf16.mxu0 %v4197_v9  ;;  %vm781_vm4 = vcmp.gt.f32.partialorder %v701_v5, 0.0 }
 0x1fe   : > { %v846_v18 = vmul.f32 0.2, %v703_v10  ;;  %v707_v22 = vadd.f32 %v706_v16, %v4037_v41  ;;  %1714 = vmatmul.mubr.bf16.gmra.mrb[48].mxu1 %v4194_v3  ;;  %1907 = vmatmul.mubr.bf16.gmra.mrb[112].mxu0 %v4194_v3  ;;  %vm782_vm5 = vcmp.gt.f32.partialorder %v703_v10, 0.0 }
 0x1ff   : > { %vm783_vm6 = vcmp.gt.f32.partialorder %v705_v14, 0.0  ;;  %v847_v23 = vmul.f32 0.2, %v705_v14  ;;  %v909_v26 = vsel %vm781_vm4, %v701_v5, %v845_v13 }
 0x200   : > { %vm784_vm7 = vcmp.gt.f32.partialorder %v707_v22, 0.0  ;;  %v848_v25 = vmul.f32 0.2, %v707_v22  ;;  %v910_v30 = vsel %vm782_vm5, %v703_v10, %v846_v18 }
 0x201   : > { %v911_v27 = vsel %vm783_vm6, %v705_v14, %v847_v23 }
 0x202   : > { %v710_v29 = vpop.f32.mrb[56].mxu0  ;;  %v912_v32 = vsel %vm784_vm7, %v707_v22, %v848_v25  ;;  %v4206_v33 = vpack.c.bf16 %v911_v27, %v909_v26 }
 0x203   : > { %v711_v35 = vadd.f32 %v710_v29, %v4033_v40  ;;  %v712_v38 = vpop.f32.mrb[57].mxu0  ;;  %v4209_v0 = vpack.c.bf16 %v912_v32, %v910_v30 }
 0x204   : > { %v713_v45 = vadd.f32 %v712_v38, %v4037_v41  ;;  %v714_v47 = vpop.f32.mrb[58].mxu0 }
 0x205   : > { %v849_v49 = vmul.f32 0.2, %v711_v35  ;;  %v715_v50 = vadd.f32 %v714_v47, %v4033_v40  ;;  %v716_v52 = vpop.f32.mrb[59].mxu0  ;;  %1723 = vmatprep.mubr.bf16.mxu1 %v4209_v0  ;;  %1916 = vmatprep.mubr.bf16.mxu0 %v4209_v0  ;;  %vm785_vm8 = vcmp.gt.f32.partialorder %v711_v35, 0.0 }
 0x206   : > { %v850_v53 = vmul.f32 0.2, %v713_v45  ;;  %v717_v55 = vadd.f32 %v716_v52, %v4037_v41  ;;  %1724 = vmatmul.mubr.bf16.gmra.mrb[52].mxu1 %v4206_v33  ;;  %1917 = vmatmul.mubr.bf16.gmra.mrb[116].mxu0 %v4206_v33  ;;  %vm786_vm9 = vcmp.gt.f32.partialorder %v713_v45, 0.0 }
 0x207   : > { %vm787_vm10 = vcmp.gt.f32.partialorder %v715_v50, 0.0  ;;  %v851_v57 = vmul.f32 0.2, %v715_v50  ;;  %v913_v62 = vsel %vm785_vm8, %v711_v35, %v849_v49 }
 0x208   : > { %vm788_vm11 = vcmp.gt.f32.partialorder %v717_v55, 0.0  ;;  %v852_v59 = vmul.f32 0.2, %v717_v55  ;;  %v914_v2 = vsel %vm786_vm9, %v713_v45, %v850_v53 }
 0x209   : > { %v915_v63 = vsel %vm787_vm10, %v715_v50, %v851_v57 }
 0x20a   : > { %v720_v1 = vpop.f32.mrb[60].mxu0  ;;  %v916_v5 = vsel %vm788_vm11, %v717_v55, %v852_v59  ;;  %v4218_v6 = vpack.c.bf16 %v915_v63, %v913_v62 }
 0x20b   : > { %v721_v10 = vadd.f32 %v720_v1, %v4033_v40  ;;  %v722_v12 = vpop.f32.mrb[61].mxu0  ;;  %v4221_v13 = vpack.c.bf16 %v916_v5, %v914_v2 }
 0x20c   : > { %v723_v14 = vadd.f32 %v722_v12, %v4037_v41  ;;  %v724_v16 = vpop.f32.mrb[62].mxu0 }
 0x20d   : > { %v853_v18 = vmul.f32 0.2, %v721_v10  ;;  %v725_v22 = vadd.f32 %v724_v16, %v4033_v40  ;;  %v726_v23 = vpop.f32.mrb[63].mxu0  ;;  %1733 = vmatprep.mubr.bf16.mxu1 %v4221_v13  ;;  %1926 = vmatprep.mubr.bf16.mxu0 %v4221_v13  ;;  %vm789_vm12 = vcmp.gt.f32.partialorder %v721_v10, 0.0 }
 0x20e   : > { %v854_v25 = vmul.f32 0.2, %v723_v14  ;;  %v727_v26 = vadd.f32 %v726_v23, %v4037_v41  ;;  %1734 = vmatmul.mubr.bf16.gmra.mrb[56].mxu1 %v4218_v6  ;;  %1927 = vmatmul.mubr.bf16.gmra.mrb[120].mxu0 %v4218_v6  ;;  %vm790_vm13 = vcmp.gt.f32.partialorder %v723_v14, 0.0  ;;  %v1061_v41 = vsub.s32 2, %v4027_v36 }
 0x20f   : > { %vm791_vm14 = vcmp.gt.f32.partialorder %v725_v22, 0.0  ;;  %v855_v27 = vmul.f32 0.2, %v725_v22  ;;  %v917_v30 = vsel %vm789_vm12, %v721_v10, %v853_v18 }
 0x210   : > { %vm792_vm15 = vcmp.gt.f32.partialorder %v727_v26, 0.0  ;;  %v856_v29 = vmul.f32 0.2, %v727_v26  ;;  %v918_v32 = vsel %vm790_vm13, %v723_v14, %v854_v25 }
 0x211   : > { %v919_v40 = vsel %vm791_vm14, %v725_v22, %v855_v27 }
 0x212   : > { %v920_v35 = vsel %vm792_vm15, %v727_v26, %v856_v29  ;;  %v4230_v38 = vpack.c.bf16 %v919_v40, %v917_v30 }
 0x213   : > { %v4232_v45 = vpack.c.bf16 %v920_v35, %v918_v32 }
 0x215   : > { %1743 = vmatprep.mubr.bf16.mxu1 %v4232_v45  ;;  %1936 = vmatprep.mubr.bf16.mxu0 %v4232_v45 }
 0x216   : > { %1744 = vmatmul.mubr.bf16.gmra.mrb[60].mxu1 %v4230_v38  ;;  %1937 = vmatmul.mubr.bf16.gmra.mrb[124].mxu0 %v4230_v38 }
 0x217   : > { %1979 = vmatprep.mubr.bf16.mxu0 %v4046_v61  ;;  %1999 = vmatprep.mubr.bf16.mxu1 %v4072_v46  ;;  %v1049_v61 = vld [vmem:[#allocation10] sm:$0x3f] }
 0x21e   : > { %1980 = vmatmul.mubr.bf16.vlgmr.msra.gmra.mrb[128].mxu0 %v4043_v58  ;;  %2000 = vmatmul.mubr.bf16.vlgmr.msra.gmra.mrb[64].mxu1 %v4069_v43  ;;  %v1065_v58 = vsub.s32 3, %v4027_v36  ;;  %v4275_v43 = vrot.slane %v1049_v61, %v356_v39 }
 0x21f   : > { %1989 = vmatprep.mubr.bf16.mxu0 %v4059_v20  ;;  %2009 = vmatprep.mubr.bf16.mxu1 %v4085_v7  ;;  %v4270_v20 = vrot.slane %v1049_v61, %v1061_v41 }
 0x220   : > { %v4277_v46 = vrot.slane %v1049_v61, %v1065_v58 }
 0x226   : > { %1990 = vmatmul.mubr.bf16.gmra.mrb[132].mxu0 %v4056_v17  ;;  %2010 = vmatmul.mubr.bf16.gmra.mrb[68].mxu1 %v4082_v4  ;;  %v4268_v17 = vrot.slane %v1049_v61, %v352_v37 }
 0x227   : > { %2019 = vmatprep.mubr.bf16.mxu1 %v4098_v31 }
 0x22e   : > { %2020 = vmatmul.mubr.bf16.gmra.mrb[72].mxu1 %v4095_v28 }
 0x22f   : > { %2029 = vmatprep.mubr.bf16.mxu1 %v4111_v60 }
 0x236   : > { %2030 = vmatmul.mubr.bf16.gmra.mrb[76].mxu1 %v4108_v56 }
 0x237   : > { %2039 = vmatprep.mubr.bf16.mxu1 %v4124_v24 }
 0x23e   : > { %2040 = vmatmul.mubr.bf16.gmra.mrb[80].mxu1 %v4121_v21 }
 0x23f   : > { %2049 = vmatprep.mubr.bf16.mxu1 %v4137_v54 }
 0x246   : > { %2050 = vmatmul.mubr.bf16.gmra.mrb[84].mxu1 %v4134_v51 }
 0x247   : > { %2059 = vmatprep.mubr.bf16.mxu1 %v4149_v19 }
 0x24e   : > { %2060 = vmatmul.mubr.bf16.gmra.mrb[88].mxu1 %v4146_v15 }
 0x24f   : > { %2069 = vmatprep.mubr.bf16.mxu1 %v4161_v48 }
 0x256   : > { %2070 = vmatmul.mubr.bf16.gmra.mrb[92].mxu1 %v4158_v44 }
 0x257   : > { %2079 = vmatprep.mubr.bf16.mxu1 %v4173_v11 }
 0x25e   : > { %2080 = vmatmul.mubr.bf16.gmra.mrb[96].mxu1 %v4170_v8 }
 0x25f   : > { %2089 = vmatprep.mubr.bf16.mxu1 %v4185_v42 }
 0x266   : > { %2090 = vmatmul.mubr.bf16.gmra.mrb[100].mxu1 %v4182_v34 }
 0x267   : > { %2099 = vmatprep.mubr.bf16.mxu1 %v4197_v9 }
 0x26e   : > { %2100 = vmatmul.mubr.bf16.gmra.mrb[104].mxu1 %v4194_v3 }
 0x26f   : > { %2109 = vmatprep.mubr.bf16.mxu1 %v4209_v0 }
 0x271   : > { %v1595_v4 = vpop.f32.mrb[0].mxu1  ;;  %v1788_v7 = vpop.f32.mrb[64].mxu0 }
 0x272   : > { %v1596_v28 = vadd.f32 %v1595_v4, %v4268_v17  ;;  %v1789_v31 = vadd.f32 %v1788_v7, %v4270_v20  ;;  %v1597_v56 = vpop.f32.mrb[1].mxu1  ;;  %v1790_v60 = vpop.f32.mrb[65].mxu0 }
 0x273   : > { %v1598_v37 = vadd.f32 %v1597_v56, %v4275_v43  ;;  %v1791_v21 = vadd.f32 %v1790_v60, %v4277_v46  ;;  %v1599_v24 = vpop.f32.mrb[2].mxu1  ;;  %v1792_v51 = vpop.f32.mrb[66].mxu0 }
 0x274   : > { %3114 = vtanh.f32 %v1596_v28  ;;  %v1600_v39 = vadd.f32 %v1599_v24, %v4268_v17  ;;  %v1601_v54 = vpop.f32.mrb[3].mxu1  ;;  %v1794_v15 = vpop.f32.mrb[67].mxu0  ;;  %v1793_v19 = vadd.f32 %v1792_v51, %v4270_v20 }
 0x275   : > { %3116 = vtanh.f32 %v1789_v31  ;;  %v1602_v44 = vadd.f32 %v1601_v54, %v4275_v43  ;;  %v1795_v48 = vadd.f32 %v1794_v15, %v4277_v46 }
 0x276   : > { %3118 = vtanh.f32 %v1598_v37  ;;  %2110 = vmatmul.mubr.bf16.gmra.mrb[108].mxu1 %v4206_v33 }
 0x277   : > { %3120 = vtanh.f32 %v1791_v21  ;;  %2119 = vmatprep.mubr.bf16.mxu1 %v4221_v13 }
 0x278   : > { %3122 = vtanh.f32 %v1600_v39 }
 0x279   : > { %3124 = vtanh.f32 %v1793_v19  ;;  %v1605_v8 = vpop.f32.mrb[4].mxu1  ;;  %v1798_v11 = vpop.f32.mrb[68].mxu0 }
 0x27a   : > { %3126 = vtanh.f32 %v1602_v44  ;;  %v1606_v34 = vadd.f32 %v1605_v8, %v4268_v17  ;;  %v1799_v42 = vadd.f32 %v1798_v11, %v4270_v20  ;;  %v1607_v3 = vpop.f32.mrb[5].mxu1  ;;  %v1800_v9 = vpop.f32.mrb[69].mxu0 }
 0x27b   : > { %3128 = vtanh.f32 %v1795_v48  ;;  %v1608_v33 = vadd.f32 %v1607_v3, %v4275_v43  ;;  %v1801_v0 = vadd.f32 %v1800_v9, %v4277_v46  ;;  %v1609_v47 = vpop.f32.mrb[6].mxu1  ;;  %v1802_v49 = vpop.f32.mrb[70].mxu0 }
 0x27c   : > { %3130 = vtanh.f32 %v1606_v34  ;;  %v1610_v50 = vadd.f32 %v1609_v47, %v4268_v17  ;;  %v1611_v52 = vpop.f32.mrb[7].mxu1  ;;  %v1804_v53 = vpop.f32.mrb[71].mxu0  ;;  %v1803_v55 = vadd.f32 %v1802_v49, %v4270_v20 }
 0x27d   : > { %3132 = vtanh.f32 %v1799_v42  ;;  %v1612_v59 = vadd.f32 %v1611_v52, %v4275_v43  ;;  %v1805_v63 = vadd.f32 %v1804_v53, %v4277_v46 }
 0x27e   : > { %v3115_v57 = vpop.eup %3114  ;;  %3134 = vtanh.f32 %v1608_v33  ;;  %2120 = vmatmul.mubr.bf16.gmra.mrb[112].mxu1 %v4218_v6 }
 0x27f   : > { %v3117_v62 = vpop.eup %3116  ;;  %2332 = vst [vmem:[%s4298_s26] sm:$0xff] %v3115_v57  ;;  %3136 = vtanh.f32 %v1801_v0  ;;  %2129 = vmatprep.mubr.bf16.mxu1 %v4232_v45 }
 0x280   : > { %v3119_v1 = vpop.eup %3118  ;;  %2334 = vst [vmem:[%s4298_s26 + $0x10] sm:$0xff] %v3117_v62  ;;  %3138 = vtanh.f32 %v1610_v50 }
 0x281   : > { %v3121_v2 = vpop.eup %3120  ;;  %2333 = vst [vmem:[%s4298_s26 + $0x8] sm:$0xff] %v3119_v1  ;;  %3140 = vtanh.f32 %v1803_v55  ;;  %v1615_v5 = vpop.f32.mrb[8].mxu1 }
 0x282   : > { %v1808_v6 = vpop.f32.mrb[72].mxu0  ;;  %v3123_v10 = vpop.eup %3122  ;;  %2335 = vst [vmem:[%s4298_s26 + $0x18] sm:$0xff] %v3121_v2  ;;  %3142 = vtanh.f32 %v1612_v59  ;;  %v1616_v12 = vadd.f32 %v1615_v5, %v4268_v17 }
 0x283   : > { %v1809_v13 = vadd.f32 %v1808_v6, %v4270_v20  ;;  %v1617_v14 = vpop.f32.mrb[9].mxu1  ;;  %v1810_v16 = vpop.f32.mrb[73].mxu0  ;;  %2338 = vst [vmem:[%s4298_s26 + $0x30] sm:$0xff] %v3123_v10  ;;  %3144 = vtanh.f32 %v1805_v63 }
 0x284   : > { %v3125_v18 = vpop.eup %3124  ;;  %v1618_v22 = vadd.f32 %v1617_v14, %v4275_v43  ;;  %v1811_v23 = vadd.f32 %v1810_v16, %v4277_v46  ;;  %v1619_v25 = vpop.f32.mrb[10].mxu1  ;;  %3146 = vtanh.f32 %v1616_v12 }
 0x285   : > { %v1812_v26 = vpop.f32.mrb[74].mxu0  ;;  %v3127_v27 = vpop.eup %3126  ;;  %2340 = vst [vmem:[%s4298_s26 + $0x40] sm:$0xff] %v3125_v18  ;;  %v1620_v29 = vadd.f32 %v1619_v25, %v4268_v17  ;;  %3148 = vtanh.f32 %v1809_v13 }
 0x286   : > { %v1621_v30 = vpop.f32.mrb[11].mxu1  ;;  %v1814_v40 = vpop.f32.mrb[75].mxu0  ;;  %2339 = vst [vmem:[%s4298_s26 + $0x38] sm:$0xff] %v3127_v27  ;;  %v1813_v35 = vadd.f32 %v1812_v26, %v4270_v20  ;;  %3150 = vtanh.f32 %v1618_v22  ;;  %2130 = vmatmul.mubr.bf16.gmra.mrb[116].mxu1 %v4230_v38 }
 0x287   : > { %v3129_v32 = vpop.eup %3128  ;;  %v1622_v41 = vadd.f32 %v1621_v30, %v4275_v43  ;;  %3152 = vtanh.f32 %v1811_v23  ;;  %v1815_v61 = vadd.f32 %v1814_v40, %v4277_v46 }
 0x288   : > { %v3131_v45 = vpop.eup %3130  ;;  %2341 = vst [vmem:[%s4298_s26 + $0x48] sm:$0xff] %v3129_v32  ;;  %3154 = vtanh.f32 %v1620_v29 }
 0x289   : > { %v3133_v58 = vpop.eup %3132  ;;  %2344 = vst [vmem:[%s4298_s26 + $0x60] sm:$0xff] %v3131_v45  ;;  %3156 = vtanh.f32 %v1813_v35  ;;  %v1625_v28 = vpop.f32.mrb[12].mxu1 }
 0x28a   : > { %v3135_v4 = vpop.eup %3134  ;;  %2346 = vst [vmem:[%s4298_s26 + $0x70] sm:$0xff] %v3133_v58  ;;  %v1818_v31 = vpop.f32.mrb[76].mxu0  ;;  %3158 = vtanh.f32 %v1622_v41  ;;  %v1626_v38 = vadd.f32 %v1625_v28, %v4268_v17 }
 0x28b   : > { %v3137_v7 = vpop.eup %3136  ;;  %2345 = vst [vmem:[%s4298_s26 + $0x68] sm:$0xff] %v3135_v4  ;;  %v1819_v60 = vadd.f32 %v1818_v31, %v4270_v20  ;;  %v1627_v37 = vpop.f32.mrb[13].mxu1  ;;  %3160 = vtanh.f32 %v1815_v61 }
 0x28c   : > { %v3139_v56 = vpop.eup %3138  ;;  %2347 = vst [vmem:[%s4298_s26 + $0x78] sm:$0xff] %v3137_v7  ;;  %v1820_v21 = vpop.f32.mrb[77].mxu0  ;;  %v1628_v51 = vadd.f32 %v1627_v37, %v4275_v43  ;;  %3162 = vtanh.f32 %v1626_v38 }
 0x28d   : > { %v3141_v24 = vpop.eup %3140  ;;  %2350 = vst [vmem:[%s4298_s26 + $0x90] sm:$0xff] %v3139_v56  ;;  %v1821_v39 = vadd.f32 %v1820_v21, %v4277_v46  ;;  %v1629_v54 = vpop.f32.mrb[14].mxu1  ;;  %3164 = vtanh.f32 %v1819_v60 }
 0x28e   : > { %v1822_v15 = vpop.f32.mrb[78].mxu0  ;;  %v3143_v19 = vpop.eup %3142  ;;  %2352 = vst [vmem:[%s4298_s26 + $0xa0] sm:$0xff] %v3141_v24  ;;  %v1630_v44 = vadd.f32 %v1629_v54, %v4268_v17  ;;  %3166 = vtanh.f32 %v1628_v51 }
 0x28f   : > { %v1631_v48 = vpop.f32.mrb[15].mxu1  ;;  %v1824_v8 = vpop.f32.mrb[79].mxu0  ;;  %2351 = vst [vmem:[%s4298_s26 + $0x98] sm:$0xff] %v3143_v19  ;;  %v1823_v34 = vadd.f32 %v1822_v15, %v4270_v20  ;;  %3168 = vtanh.f32 %v1821_v39 }
 0x290   : > { %v3145_v11 = vpop.eup %3144  ;;  %v1632_v3 = vadd.f32 %v1631_v48, %v4275_v43  ;;  %v1825_v33 = vadd.f32 %v1824_v8, %v4277_v46  ;;  %3170 = vtanh.f32 %v1630_v44 }
 0x291   : > { %v3147_v42 = vpop.eup %3146  ;;  %2353 = vst [vmem:[%s4298_s26 + $0xa8] sm:$0xff] %v3145_v11  ;;  %3172 = vtanh.f32 %v1823_v34  ;;  %v1635_v49 = vpop.f32.mrb[16].mxu1 }
 0x292   : > { %v3149_v9 = vpop.eup %3148  ;;  %2356 = vst [vmem:[%s4298_s26 + $0xc0] sm:$0xff] %v3147_v42  ;;  %v1828_v50 = vpop.f32.mrb[80].mxu0  ;;  %3174 = vtanh.f32 %v1632_v3  ;;  %v1636_v53 = vadd.f32 %v1635_v49, %v4268_v17 }
 0x293   : > { %v3151_v0 = vpop.eup %3150  ;;  %2358 = vst [vmem:[%s4298_s26 + $0xd0] sm:$0xff] %v3149_v9  ;;  %v1829_v55 = vadd.f32 %v1828_v50, %v4270_v20  ;;  %v1637_v57 = vpop.f32.mrb[17].mxu1  ;;  %3176 = vtanh.f32 %v1825_v33 }
 0x294   : > { %v3153_v47 = vpop.eup %3152  ;;  %2357 = vst [vmem:[%s4298_s26 + $0xc8] sm:$0xff] %v3151_v0  ;;  %v1830_v59 = vpop.f32.mrb[81].mxu0  ;;  %v1638_v63 = vadd.f32 %v1637_v57, %v4275_v43  ;;  %3178 = vtanh.f32 %v1636_v53 }
 0x295   : > { %v3155_v52 = vpop.eup %3154  ;;  %2359 = vst [vmem:[%s4298_s26 + $0xd8] sm:$0xff] %v3153_v47  ;;  %v1831_v1 = vadd.f32 %v1830_v59, %v4277_v46  ;;  %v1639_v2 = vpop.f32.mrb[18].mxu1  ;;  %3180 = vtanh.f32 %v1829_v55 }
 0x296   : > { %v3157_v62 = vpop.eup %3156  ;;  %2362 = vst [vmem:[%s4298_s26 + $0xf0] sm:$0xff] %v3155_v52  ;;  %v1832_v5 = vpop.f32.mrb[82].mxu0  ;;  %v1640_v10 = vadd.f32 %v1639_v2, %v4268_v17  ;;  %3182 = vtanh.f32 %v1638_v63 }
 0x297   : > { %v3159_v6 = vpop.eup %3158  ;;  %2364 = vst [vmem:[%s4298_s26 + $0x100] sm:$0xff] %v3157_v62  ;;  %v1641_v12 = vpop.f32.mrb[19].mxu1  ;;  %v1833_v16 = vadd.f32 %v1832_v5, %v4270_v20  ;;  %3184 = vtanh.f32 %v1831_v1 }
 0x298   : > { %v1834_v13 = vpop.f32.mrb[83].mxu0  ;;  %v3161_v14 = vpop.eup %3160  ;;  %2363 = vst [vmem:[%s4298_s26 + $0xf8] sm:$0xff] %v3159_v6  ;;  %v1642_v22 = vadd.f32 %v1641_v12, %v4275_v43  ;;  %3186 = vtanh.f32 %v1640_v10 }
 0x299   : > { %v3163_v18 = vpop.eup %3162  ;;  %2365 = vst [vmem:[%s4298_s26 + $0x108] sm:$0xff] %v3161_v14  ;;  %v1835_v25 = vadd.f32 %v1834_v13, %v4277_v46  ;;  %3188 = vtanh.f32 %v1833_v16  ;;  %v1645_v29 = vpop.f32.mrb[20].mxu1 }
 0x29a   : > { %v3165_v23 = vpop.eup %3164  ;;  %2368 = vst [vmem:[%s4298_s26 + $0x120] sm:$0xff] %v3163_v18  ;;  %v1838_v30 = vpop.f32.mrb[84].mxu0  ;;  %3190 = vtanh.f32 %v1642_v22  ;;  %v1646_v32 = vadd.f32 %v1645_v29, %v4268_v17 }
 0x29b   : > { %v3167_v26 = vpop.eup %3166  ;;  %2370 = vst [vmem:[%s4298_s26 + $0x130] sm:$0xff] %v3165_v23  ;;  %v1839_v35 = vadd.f32 %v1838_v30, %v4270_v20  ;;  %v1647_v45 = vpop.f32.mrb[21].mxu1  ;;  %3192 = vtanh.f32 %v1835_v25 }
 0x29c   : > { %v3169_v27 = vpop.eup %3168  ;;  %2369 = vst [vmem:[%s4298_s26 + $0x128] sm:$0xff] %v3167_v26  ;;  %v1840_v41 = vpop.f32.mrb[85].mxu0  ;;  %v1648_v61 = vadd.f32 %v1647_v45, %v4275_v43  ;;  %3194 = vtanh.f32 %v1646_v32 }
 0x29d   : > { %v3171_v40 = vpop.eup %3170  ;;  %2371 = vst [vmem:[%s4298_s26 + $0x138] sm:$0xff] %v3169_v27  ;;  %v1841_v4 = vadd.f32 %v1840_v41, %v4277_v46  ;;  %v1649_v7 = vpop.f32.mrb[22].mxu1  ;;  %3196 = vtanh.f32 %v1839_v35 }
 0x29e   : > { %v3173_v58 = vpop.eup %3172  ;;  %2374 = vst [vmem:[%s4298_s26 + $0x150] sm:$0xff] %v3171_v40  ;;  %v1842_v28 = vpop.f32.mrb[86].mxu0  ;;  %v1650_v56 = vadd.f32 %v1649_v7, %v4268_v17  ;;  %3198 = vtanh.f32 %v1648_v61 }
 0x29f   : > { %v3175_v31 = vpop.eup %3174  ;;  %2376 = vst [vmem:[%s4298_s26 + $0x160] sm:$0xff] %v3173_v58  ;;  %v1651_v38 = vpop.f32.mrb[23].mxu1  ;;  %v1843_v21 = vadd.f32 %v1842_v28, %v4270_v20  ;;  %3200 = vtanh.f32 %v1841_v4 }
 0x2a0   : > { %v1844_v60 = vpop.f32.mrb[87].mxu0  ;;  %v3177_v37 = vpop.eup %3176  ;;  %2375 = vst [vmem:[%s4298_s26 + $0x158] sm:$0xff] %v3175_v31  ;;  %v1652_v51 = vadd.f32 %v1651_v38, %v4275_v43  ;;  %3202 = vtanh.f32 %v1650_v56 }
 0x2a1   : > { %v3179_v24 = vpop.eup %3178  ;;  %2377 = vst [vmem:[%s4298_s26 + $0x168] sm:$0xff] %v3177_v37  ;;  %v1845_v54 = vadd.f32 %v1844_v60, %v4277_v46  ;;  %3204 = vtanh.f32 %v1843_v21  ;;  %v1655_v44 = vpop.f32.mrb[24].mxu1 }
 0x2a2   : > { %v3181_v39 = vpop.eup %3180  ;;  %2380 = vst [vmem:[%s4298_s26 + $0x180] sm:$0xff] %v3179_v24  ;;  %v1848_v48 = vpop.f32.mrb[88].mxu0  ;;  %3206 = vtanh.f32 %v1652_v51  ;;  %v1656_v11 = vadd.f32 %v1655_v44, %v4268_v17 }
 0x2a3   : > { %v3183_v15 = vpop.eup %3182  ;;  %2382 = vst [vmem:[%s4298_s26 + $0x190] sm:$0xff] %v3181_v39  ;;  %v1849_v34 = vadd.f32 %v1848_v48, %v4270_v20  ;;  %v1657_v42 = vpop.f32.mrb[25].mxu1  ;;  %3208 = vtanh.f32 %v1845_v54 }
 0x2a4   : > { %v3185_v19 = vpop.eup %3184  ;;  %2381 = vst [vmem:[%s4298_s26 + $0x188] sm:$0xff] %v3183_v15  ;;  %v1850_v3 = vpop.f32.mrb[89].mxu0  ;;  %v1658_v33 = vadd.f32 %v1657_v42, %v4275_v43  ;;  %3210 = vtanh.f32 %v1656_v11 }
 0x2a5   : > { %v3187_v8 = vpop.eup %3186  ;;  %2383 = vst [vmem:[%s4298_s26 + $0x198] sm:$0xff] %v3185_v19  ;;  %v1851_v0 = vadd.f32 %v1850_v3, %v4277_v46  ;;  %v1659_v47 = vpop.f32.mrb[26].mxu1  ;;  %3212 = vtanh.f32 %v1849_v34 }
 0x2a6   : > { %v3189_v9 = vpop.eup %3188  ;;  %2386 = vst [vmem:[%s4298_s26 + $0x1b0] sm:$0xff] %v3187_v8  ;;  %v1852_v49 = vpop.f32.mrb[90].mxu0  ;;  %v1660_v52 = vadd.f32 %v1659_v47, %v4268_v17  ;;  %3214 = vtanh.f32 %v1658_v33 }
 0x2a7   : > { %v3191_v50 = vpop.eup %3190  ;;  %2388 = vst [vmem:[%s4298_s26 + $0x1c0] sm:$0xff] %v3189_v9  ;;  %v1661_v53 = vpop.f32.mrb[27].mxu1  ;;  %v1853_v59 = vadd.f32 %v1852_v49, %v4270_v20  ;;  %3216 = vtanh.f32 %v1851_v0 }
 0x2a8   : > { %v1854_v55 = vpop.f32.mrb[91].mxu0  ;;  %v3193_v57 = vpop.eup %3192  ;;  %2387 = vst [vmem:[%s4298_s26 + $0x1b8] sm:$0xff] %v3191_v50  ;;  %v1662_v63 = vadd.f32 %v1661_v53, %v4275_v43  ;;  %3218 = vtanh.f32 %v1660_v52 }
 0x2a9   : > { %v3195_v62 = vpop.eup %3194  ;;  %2389 = vst [vmem:[%s4298_s26 + $0x1c8] sm:$0xff] %v3193_v57  ;;  %v1855_v2 = vadd.f32 %v1854_v55, %v4277_v46  ;;  %3220 = vtanh.f32 %v1853_v59  ;;  %v1665_v10 = vpop.f32.mrb[28].mxu1 }
 0x2aa   : > { %v3197_v1 = vpop.eup %3196  ;;  %2392 = vst [vmem:[%s4298_s26 + $0x1e0] sm:$0xff] %v3195_v62  ;;  %v1858_v12 = vpop.f32.mrb[92].mxu0  ;;  %3222 = vtanh.f32 %v1662_v63  ;;  %v1666_v14 = vadd.f32 %v1665_v10, %v4268_v17 }
 0x2ab   : > { %v3199_v5 = vpop.eup %3198  ;;  %2394 = vst [vmem:[%s4298_s26 + $0x1f0] sm:$0xff] %v3197_v1  ;;  %v1859_v16 = vadd.f32 %v1858_v12, %v4270_v20  ;;  %v1667_v18 = vpop.f32.mrb[29].mxu1  ;;  %3224 = vtanh.f32 %v1855_v2 }
 0x2ac   : > { %v3201_v6 = vpop.eup %3200  ;;  %2393 = vst [vmem:[%s4298_s26 + $0x1e8] sm:$0xff] %v3199_v5  ;;  %v1860_v22 = vpop.f32.mrb[93].mxu0  ;;  %v1668_v25 = vadd.f32 %v1667_v18, %v4275_v43  ;;  %3226 = vtanh.f32 %v1666_v14 }
 0x2ad   : > { %v3203_v13 = vpop.eup %3202  ;;  %2395 = vst [vmem:[%s4298_s26 + $0x1f8] sm:$0xff] %v3201_v6  ;;  %v1861_v26 = vadd.f32 %v1860_v22, %v4277_v46  ;;  %v1669_v27 = vpop.f32.mrb[30].mxu1  ;;  %3228 = vtanh.f32 %v1859_v16 }
 0x2ae   : > { %v3205_v23 = vpop.eup %3204  ;;  %2398 = vst [vmem:[%s4298_s26 + $0x210] sm:$0xff] %v3203_v13  ;;  %v1862_v29 = vpop.f32.mrb[94].mxu0  ;;  %v1670_v40 = vadd.f32 %v1669_v27, %v4268_v17  ;;  %3230 = vtanh.f32 %v1668_v25 }
 0x2af   : > { %v3207_v30 = vpop.eup %3206  ;;  %2400 = vst [vmem:[%s4298_s26 + $0x220] sm:$0xff] %v3205_v23  ;;  %v1671_v32 = vpop.f32.mrb[31].mxu1  ;;  %v1863_v41 = vadd.f32 %v1862_v29, %v4270_v20  ;;  %3232 = vtanh.f32 %v1861_v26 }
 0x2b0   : > { %v1864_v35 = vpop.f32.mrb[95].mxu0  ;;  %v3209_v45 = vpop.eup %3208  ;;  %2399 = vst [vmem:[%s4298_s26 + $0x218] sm:$0xff] %v3207_v30  ;;  %v1672_v61 = vadd.f32 %v1671_v32, %v4275_v43  ;;  %3234 = vtanh.f32 %v1670_v40 }
 0x2b1   : > { %v3211_v58 = vpop.eup %3210  ;;  %2401 = vst [vmem:[%s4298_s26 + $0x228] sm:$0xff] %v3209_v45  ;;  %v1865_v7 = vadd.f32 %v1864_v35, %v4277_v46  ;;  %3236 = vtanh.f32 %v1863_v41  ;;  %v1675_v56 = vpop.f32.mrb[32].mxu1 }
 0x2b2   : > { %v3213_v4 = vpop.eup %3212  ;;  %2404 = vst [vmem:[%s4298_s26 + $0x240] sm:$0xff] %v3211_v58  ;;  %v1868_v38 = vpop.f32.mrb[96].mxu0  ;;  %3238 = vtanh.f32 %v1672_v61  ;;  %v1676_v37 = vadd.f32 %v1675_v56, %v4268_v17 }
 0x2b3   : > { %v3215_v28 = vpop.eup %3214  ;;  %2406 = vst [vmem:[%s4298_s26 + $0x250] sm:$0xff] %v3213_v4  ;;  %v1869_v21 = vadd.f32 %v1868_v38, %v4270_v20  ;;  %v1677_v24 = vpop.f32.mrb[33].mxu1  ;;  %3240 = vtanh.f32 %v1865_v7 }
 0x2b4   : > { %v3217_v31 = vpop.eup %3216  ;;  %2405 = vst [vmem:[%s4298_s26 + $0x248] sm:$0xff] %v3215_v28  ;;  %v1870_v51 = vpop.f32.mrb[97].mxu0  ;;  %v1678_v54 = vadd.f32 %v1677_v24, %v4275_v43  ;;  %3242 = vtanh.f32 %v1676_v37 }
 0x2b5   : > { %v3219_v60 = vpop.eup %3218  ;;  %2407 = vst [vmem:[%s4298_s26 + $0x258] sm:$0xff] %v3217_v31  ;;  %v1871_v15 = vadd.f32 %v1870_v51, %v4277_v46  ;;  %v1679_v19 = vpop.f32.mrb[34].mxu1  ;;  %3244 = vtanh.f32 %v1869_v21 }
 0x2b6   : > { %v3221_v39 = vpop.eup %3220  ;;  %2410 = vst [vmem:[%s4298_s26 + $0x270] sm:$0xff] %v3219_v60  ;;  %v1872_v44 = vpop.f32.mrb[98].mxu0  ;;  %v1680_v8 = vadd.f32 %v1679_v19, %v4268_v17  ;;  %3246 = vtanh.f32 %v1678_v54 }
 0x2b7   : > { %v3223_v48 = vpop.eup %3222  ;;  %2412 = vst [vmem:[%s4298_s26 + $0x280] sm:$0xff] %v3221_v39  ;;  %v1681_v11 = vpop.f32.mrb[35].mxu1  ;;  %v1873_v3 = vadd.f32 %v1872_v44, %v4270_v20  ;;  %3248 = vtanh.f32 %v1871_v15 }
 0x2b8   : > { %v1874_v34 = vpop.f32.mrb[99].mxu0  ;;  %v3225_v42 = vpop.eup %3224  ;;  %2411 = vst [vmem:[%s4298_s26 + $0x278] sm:$0xff] %v3223_v48  ;;  %v1682_v33 = vadd.f32 %v1681_v11, %v4275_v43  ;;  %3250 = vtanh.f32 %v1680_v8 }
 0x2b9   : > { %v3227_v9 = vpop.eup %3226  ;;  %2413 = vst [vmem:[%s4298_s26 + $0x288] sm:$0xff] %v3225_v42  ;;  %v1875_v47 = vadd.f32 %v1874_v34, %v4277_v46  ;;  %3252 = vtanh.f32 %v1873_v3  ;;  %v1685_v52 = vpop.f32.mrb[36].mxu1 }
 0x2ba   : > { %v3229_v0 = vpop.eup %3228  ;;  %2416 = vst [vmem:[%s4298_s26 + $0x2a0] sm:$0xff] %v3227_v9  ;;  %v1878_v53 = vpop.f32.mrb[100].mxu0  ;;  %3254 = vtanh.f32 %v1682_v33  ;;  %v1686_v57 = vadd.f32 %v1685_v52, %v4268_v17 }
 0x2bb   : > { %v3231_v49 = vpop.eup %3230  ;;  %2418 = vst [vmem:[%s4298_s26 + $0x2b0] sm:$0xff] %v3229_v0  ;;  %v1879_v59 = vadd.f32 %v1878_v53, %v4270_v20  ;;  %v1687_v62 = vpop.f32.mrb[37].mxu1  ;;  %3256 = vtanh.f32 %v1875_v47 }
 0x2bc   : > { %v3233_v50 = vpop.eup %3232  ;;  %2417 = vst [vmem:[%s4298_s26 + $0x2a8] sm:$0xff] %v3231_v49  ;;  %v1880_v63 = vpop.f32.mrb[101].mxu0  ;;  %v1688_v2 = vadd.f32 %v1687_v62, %v4275_v43  ;;  %3258 = vtanh.f32 %v1686_v57 }
 0x2bd   : > { %v3235_v55 = vpop.eup %3234  ;;  %2419 = vst [vmem:[%s4298_s26 + $0x2b8] sm:$0xff] %v3233_v50  ;;  %v1881_v5 = vadd.f32 %v1880_v63, %v4277_v46  ;;  %v1689_v6 = vpop.f32.mrb[38].mxu1  ;;  %3260 = vtanh.f32 %v1879_v59 }
 0x2be   : > { %v3237_v1 = vpop.eup %3236  ;;  %2422 = vst [vmem:[%s4298_s26 + $0x2d0] sm:$0xff] %v3235_v55  ;;  %v1882_v10 = vpop.f32.mrb[102].mxu0  ;;  %v1690_v13 = vadd.f32 %v1689_v6, %v4268_v17  ;;  %3262 = vtanh.f32 %v1688_v2 }
 0x2bf   : > { %v3239_v12 = vpop.eup %3238  ;;  %2424 = vst [vmem:[%s4298_s26 + $0x2e0] sm:$0xff] %v3237_v1  ;;  %v1691_v14 = vpop.f32.mrb[39].mxu1  ;;  %v1883_v22 = vadd.f32 %v1882_v10, %v4270_v20  ;;  %3264 = vtanh.f32 %v1881_v5 }
 0x2c0   : > { %v1884_v16 = vpop.f32.mrb[103].mxu0  ;;  %v3241_v18 = vpop.eup %3240  ;;  %2423 = vst [vmem:[%s4298_s26 + $0x2d8] sm:$0xff] %v3239_v12  ;;  %v1692_v25 = vadd.f32 %v1691_v14, %v4275_v43  ;;  %3266 = vtanh.f32 %v1690_v13 }
 0x2c1   : > { %v3243_v23 = vpop.eup %3242  ;;  %2425 = vst [vmem:[%s4298_s26 + $0x2e8] sm:$0xff] %v3241_v18  ;;  %v1885_v27 = vadd.f32 %v1884_v16, %v4277_v46  ;;  %3268 = vtanh.f32 %v1883_v22  ;;  %v1695_v40 = vpop.f32.mrb[40].mxu1 }
 0x2c2   : > { %v3245_v26 = vpop.eup %3244  ;;  %2428 = vst [vmem:[%s4298_s26 + $0x300] sm:$0xff] %v3243_v23  ;;  %v1888_v32 = vpop.f32.mrb[104].mxu0  ;;  %3270 = vtanh.f32 %v1692_v25  ;;  %v1696_v45 = vadd.f32 %v1695_v40, %v4268_v17 }
 0x2c3   : > { %v3247_v29 = vpop.eup %3246  ;;  %2430 = vst [vmem:[%s4298_s26 + $0x310] sm:$0xff] %v3245_v26  ;;  %v1889_v41 = vadd.f32 %v1888_v32, %v4270_v20  ;;  %v1697_v58 = vpop.f32.mrb[41].mxu1  ;;  %3272 = vtanh.f32 %v1885_v27 }
 0x2c4   : > { %v3249_v30 = vpop.eup %3248  ;;  %2429 = vst [vmem:[%s4298_s26 + $0x308] sm:$0xff] %v3247_v29  ;;  %v1890_v61 = vpop.f32.mrb[105].mxu0  ;;  %v1698_v7 = vadd.f32 %v1697_v58, %v4275_v43  ;;  %3274 = vtanh.f32 %v1696_v45 }
 0x2c5   : > { %v3251_v35 = vpop.eup %3250  ;;  %2431 = vst [vmem:[%s4298_s26 + $0x318] sm:$0xff] %v3249_v30  ;;  %v1891_v28 = vadd.f32 %v1890_v61, %v4277_v46  ;;  %v1699_v31 = vpop.f32.mrb[42].mxu1  ;;  %3276 = vtanh.f32 %v1889_v41 }
 0x2c6   : > { %v3253_v4 = vpop.eup %3252  ;;  %2434 = vst [vmem:[%s4298_s26 + $0x330] sm:$0xff] %v3251_v35  ;;  %v1892_v56 = vpop.f32.mrb[106].mxu0  ;;  %v1700_v60 = vadd.f32 %v1699_v31, %v4268_v17  ;;  %3278 = vtanh.f32 %v1698_v7 }
 0x2c7   : > { %v3255_v38 = vpop.eup %3254  ;;  %2436 = vst [vmem:[%s4298_s26 + $0x340] sm:$0xff] %v3253_v4  ;;  %v1701_v37 = vpop.f32.mrb[43].mxu1  ;;  %v1893_v51 = vadd.f32 %v1892_v56, %v4270_v20  ;;  %3280 = vtanh.f32 %v1891_v28 }
 0x2c8   : > { %v1894_v21 = vpop.f32.mrb[107].mxu0  ;;  %v3257_v24 = vpop.eup %3256  ;;  %2435 = vst [vmem:[%s4298_s26 + $0x338] sm:$0xff] %v3255_v38  ;;  %v1702_v54 = vadd.f32 %v1701_v37, %v4275_v43  ;;  %3282 = vtanh.f32 %v1700_v60 }
 0x2c9   : > { %v3259_v39 = vpop.eup %3258  ;;  %2437 = vst [vmem:[%s4298_s26 + $0x348] sm:$0xff] %v3257_v24  ;;  %v1895_v19 = vadd.f32 %v1894_v21, %v4277_v46  ;;  %3284 = vtanh.f32 %v1893_v51  ;;  %v1705_v8 = vpop.f32.mrb[44].mxu1 }
 0x2ca   : > { %v3261_v15 = vpop.eup %3260  ;;  %2440 = vst [vmem:[%s4298_s26 + $0x360] sm:$0xff] %v3259_v39  ;;  %v1898_v11 = vpop.f32.mrb[108].mxu0  ;;  %3286 = vtanh.f32 %v1702_v54  ;;  %v1706_v42 = vadd.f32 %v1705_v8, %v4268_v17 }
 0x2cb   : > { %v3263_v44 = vpop.eup %3262  ;;  %2442 = vst [vmem:[%s4298_s26 + $0x370] sm:$0xff] %v3261_v15  ;;  %v1899_v3 = vadd.f32 %v1898_v11, %v4270_v20  ;;  %v1707_v9 = vpop.f32.mrb[45].mxu1  ;;  %3288 = vtanh.f32 %v1895_v19 }
 0x2cc   : > { %v3265_v48 = vpop.eup %3264  ;;  %2441 = vst [vmem:[%s4298_s26 + $0x368] sm:$0xff] %v3263_v44  ;;  %v1900_v33 = vpop.f32.mrb[109].mxu0  ;;  %v1708_v47 = vadd.f32 %v1707_v9, %v4275_v43  ;;  %3290 = vtanh.f32 %v1706_v42 }
 0x2cd   : > { %v3267_v34 = vpop.eup %3266  ;;  %2443 = vst [vmem:[%s4298_s26 + $0x378] sm:$0xff] %v3265_v48  ;;  %v1901_v49 = vadd.f32 %v1900_v33, %v4277_v46  ;;  %v1709_v50 = vpop.f32.mrb[46].mxu1  ;;  %3292 = vtanh.f32 %v1899_v3 }
 0x2ce   : > { %v3269_v0 = vpop.eup %3268  ;;  %2446 = vst [vmem:[%s4298_s26 + $0x390] sm:$0xff] %v3267_v34  ;;  %v1902_v52 = vpop.f32.mrb[110].mxu0  ;;  %v1710_v55 = vadd.f32 %v1709_v50, %v4268_v17  ;;  %3294 = vtanh.f32 %v1708_v47 }
 0x2cf   : > { %v3271_v53 = vpop.eup %3270  ;;  %2448 = vst [vmem:[%s4298_s26 + $0x3a0] sm:$0xff] %v3269_v0  ;;  %v1711_v57 = vpop.f32.mrb[47].mxu1  ;;  %v1903_v63 = vadd.f32 %v1902_v52, %v4270_v20  ;;  %3296 = vtanh.f32 %v1901_v49 }
 0x2d0   : > { %v1904_v59 = vpop.f32.mrb[111].mxu0  ;;  %v3273_v62 = vpop.eup %3272  ;;  %2447 = vst [vmem:[%s4298_s26 + $0x398] sm:$0xff] %v3271_v53  ;;  %v1712_v2 = vadd.f32 %v1711_v57, %v4275_v43  ;;  %3298 = vtanh.f32 %v1710_v55 }
 0x2d1   : > { %v3275_v1 = vpop.eup %3274  ;;  %2449 = vst [vmem:[%s4298_s26 + $0x3a8] sm:$0xff] %v3273_v62  ;;  %v1905_v6 = vadd.f32 %v1904_v59, %v4277_v46  ;;  %3300 = vtanh.f32 %v1903_v63  ;;  %v1715_v13 = vpop.f32.mrb[48].mxu1 }
 0x2d2   : > { %v3277_v5 = vpop.eup %3276  ;;  %2452 = vst [vmem:[%s4298_s26 + $0x3c0] sm:$0xff] %v3275_v1  ;;  %v1908_v14 = vpop.f32.mrb[112].mxu0  ;;  %3302 = vtanh.f32 %v1712_v2  ;;  %v1716_v18 = vadd.f32 %v1715_v13, %v4268_v17 }
 0x2d3   : > { %v3279_v10 = vpop.eup %3278  ;;  %2454 = vst [vmem:[%s4298_s26 + $0x3d0] sm:$0xff] %v3277_v5  ;;  %v1909_v22 = vadd.f32 %v1908_v14, %v4270_v20  ;;  %v1717_v23 = vpop.f32.mrb[49].mxu1  ;;  %3304 = vtanh.f32 %v1905_v6 }
 0x2d4   : > { %v3281_v12 = vpop.eup %3280  ;;  %2453 = vst [vmem:[%s4298_s26 + $0x3c8] sm:$0xff] %v3279_v10  ;;  %v1910_v25 = vpop.f32.mrb[113].mxu0  ;;  %v1718_v27 = vadd.f32 %v1717_v23, %v4275_v43  ;;  %3306 = vtanh.f32 %v1716_v18 }
 0x2d5   : > { %v3283_v16 = vpop.eup %3282  ;;  %2455 = vst [vmem:[%s4298_s26 + $0x3d8] sm:$0xff] %v3281_v12  ;;  %v1911_v29 = vadd.f32 %v1910_v25, %v4277_v46  ;;  %v1719_v30 = vpop.f32.mrb[50].mxu1  ;;  %3308 = vtanh.f32 %v1909_v22 }
 0x2d6   : > { %v3285_v26 = vpop.eup %3284  ;;  %2458 = vst [vmem:[%s4298_s26 + $0x3f0] sm:$0xff] %v3283_v16  ;;  %v1912_v40 = vpop.f32.mrb[114].mxu0  ;;  %v1720_v35 = vadd.f32 %v1719_v30, %v4268_v17  ;;  %3310 = vtanh.f32 %v1718_v27 }
 0x2d7   : > { %v3287_v32 = vpop.eup %3286  ;;  %2460 = vst [vmem:[%s4298_s26 + $0x400] sm:$0xff] %v3285_v26  ;;  %v1721_v45 = vpop.f32.mrb[51].mxu1  ;;  %v1913_v61 = vadd.f32 %v1912_v40, %v4270_v20  ;;  %3312 = vtanh.f32 %v1911_v29 }
 0x2d8   : > { %v1914_v41 = vpop.f32.mrb[115].mxu0  ;;  %v3289_v58 = vpop.eup %3288  ;;  %2459 = vst [vmem:[%s4298_s26 + $0x3f8] sm:$0xff] %v3287_v32  ;;  %v1722_v7 = vadd.f32 %v1721_v45, %v4275_v43  ;;  %3314 = vtanh.f32 %v1720_v35 }
 0x2d9   : > { %v3291_v4 = vpop.eup %3290  ;;  %2461 = vst [vmem:[%s4298_s26 + $0x408] sm:$0xff] %v3289_v58  ;;  %v1915_v31 = vadd.f32 %v1914_v41, %v4277_v46  ;;  %3316 = vtanh.f32 %v1913_v61  ;;  %v1725_v60 = vpop.f32.mrb[52].mxu1  ;;  %v1069_v58 = vsub.s32 4, %v4027_v36 }
 0x2da   : > { %v3293_v28 = vpop.eup %3292  ;;  %2464 = vst [vmem:[%s4298_s26 + $0x420] sm:$0xff] %v3291_v4  ;;  %v1918_v37 = vpop.f32.mrb[116].mxu0  ;;  %3318 = vtanh.f32 %v1722_v7  ;;  %v1726_v24 = vadd.f32 %v1725_v60, %v4268_v17 }
 0x2db   : > { %v3295_v56 = vpop.eup %3294  ;;  %2466 = vst [vmem:[%s4298_s26 + $0x430] sm:$0xff] %v3293_v28  ;;  %v1919_v51 = vadd.f32 %v1918_v37, %v4270_v20  ;;  %v1727_v39 = vpop.f32.mrb[53].mxu1  ;;  %3320 = vtanh.f32 %v1915_v31 }
 0x2dc   : > { %v3297_v38 = vpop.eup %3296  ;;  %2465 = vst [vmem:[%s4298_s26 + $0x428] sm:$0xff] %v3295_v56  ;;  %v1920_v54 = vpop.f32.mrb[117].mxu0  ;;  %v1728_v19 = vadd.f32 %v1727_v39, %v4275_v43  ;;  %3322 = vtanh.f32 %v1726_v24  ;;  %v1073_v56 = vsub.s32 5, %v4027_v36 }
 0x2dd   : > { %v3299_v21 = vpop.eup %3298  ;;  %2467 = vst [vmem:[%s4298_s26 + $0x438] sm:$0xff] %v3297_v38  ;;  %v1921_v44 = vadd.f32 %v1920_v54, %v4277_v46  ;;  %v1729_v48 = vpop.f32.mrb[54].mxu1  ;;  %3324 = vtanh.f32 %v1919_v51 }
 0x2de   : > { %v3301_v15 = vpop.eup %3300  ;;  %2470 = vst [vmem:[%s4298_s26 + $0x450] sm:$0xff] %v3299_v21  ;;  %v1922_v8 = vpop.f32.mrb[118].mxu0  ;;  %v1730_v34 = vadd.f32 %v1729_v48, %v4268_v17  ;;  %3326 = vtanh.f32 %v1728_v19  ;;  %v3498_v48 = vld [vmem:[#allocation10] sm:$0x3f] }
 0x2df   : > { %v3303_v11 = vpop.eup %3302  ;;  %2472 = vst [vmem:[%s4298_s26 + $0x460] sm:$0xff] %v3301_v15  ;;  %v1731_v42 = vpop.f32.mrb[55].mxu1  ;;  %v1923_v33 = vadd.f32 %v1922_v8, %v4270_v20  ;;  %3328 = vtanh.f32 %v1921_v44  ;;  %v4528_v8 = vrot.slane %v3498_v48, %v1069_v58 }
 0x2e0   : > { %v1924_v3 = vpop.f32.mrb[119].mxu0  ;;  %v3305_v9 = vpop.eup %3304  ;;  %2471 = vst [vmem:[%s4298_s26 + $0x458] sm:$0xff] %v3303_v11  ;;  %v1732_v47 = vadd.f32 %v1731_v42, %v4275_v43  ;;  %3330 = vtanh.f32 %v1730_v34  ;;  %v4532_v34 = vrot.slane %v3498_v48, %v1073_v56 }
 0x2e1   : > { %v3307_v0 = vpop.eup %3306  ;;  %2473 = vst [vmem:[%s4298_s26 + $0x468] sm:$0xff] %v3305_v9  ;;  %v1925_v50 = vadd.f32 %v1924_v3, %v4277_v46  ;;  %3332 = vtanh.f32 %v1923_v33  ;;  %v1735_v55 = vpop.f32.mrb[56].mxu1 }
 0x2e2   : > { %v3309_v49 = vpop.eup %3308  ;;  %2476 = vst [vmem:[%s4298_s26 + $0x480] sm:$0xff] %v3307_v0  ;;  %v1928_v57 = vpop.f32.mrb[120].mxu0  ;;  %3334 = vtanh.f32 %v1732_v47  ;;  %v1736_v62 = vadd.f32 %v1735_v55, %v4268_v17 }
 0x2e3   : > { %v3311_v52 = vpop.eup %3310  ;;  %2478 = vst [vmem:[%s4298_s26 + $0x490] sm:$0xff] %v3309_v49  ;;  %v1929_v63 = vadd.f32 %v1928_v57, %v4270_v20  ;;  %v1737_v1 = vpop.f32.mrb[57].mxu1  ;;  %3336 = vtanh.f32 %v1925_v50 }
 0x2e4   : > { %v3313_v53 = vpop.eup %3312  ;;  %2477 = vst [vmem:[%s4298_s26 + $0x488] sm:$0xff] %v3311_v52  ;;  %v1930_v2 = vpop.f32.mrb[121].mxu0  ;;  %v1738_v6 = vadd.f32 %v1737_v1, %v4275_v43  ;;  %3338 = vtanh.f32 %v1736_v62 }
 0x2e5   : > { %v3315_v59 = vpop.eup %3314  ;;  %2479 = vst [vmem:[%s4298_s26 + $0x498] sm:$0xff] %v3313_v53  ;;  %v1931_v10 = vadd.f32 %v1930_v2, %v4277_v46  ;;  %v1739_v12 = vpop.f32.mrb[58].mxu1  ;;  %3340 = vtanh.f32 %v1929_v63 }
 0x2e6   : > { %v3317_v5 = vpop.eup %3316  ;;  %2482 = vst [vmem:[%s4298_s26 + $0x4b0] sm:$0xff] %v3315_v59  ;;  %v1932_v13 = vpop.f32.mrb[122].mxu0  ;;  %v1740_v16 = vadd.f32 %v1739_v12, %v4268_v17  ;;  %3342 = vtanh.f32 %v1738_v6 }
 0x2e7   : > { %v3319_v14 = vpop.eup %3318  ;;  %2484 = vst [vmem:[%s4298_s26 + $0x4c0] sm:$0xff] %v3317_v5  ;;  %v1741_v18 = vpop.f32.mrb[59].mxu1  ;;  %v1933_v25 = vadd.f32 %v1932_v13, %v4270_v20  ;;  %3344 = vtanh.f32 %v1931_v10 }
 0x2e8   : > { %v1934_v22 = vpop.f32.mrb[123].mxu0  ;;  %v3321_v23 = vpop.eup %3320  ;;  %2483 = vst [vmem:[%s4298_s26 + $0x4b8] sm:$0xff] %v3319_v14  ;;  %v1742_v27 = vadd.f32 %v1741_v18, %v4275_v43  ;;  %3346 = vtanh.f32 %v1740_v16 }
 0x2e9   : > { %v3323_v26 = vpop.eup %3322  ;;  %2485 = vst [vmem:[%s4298_s26 + $0x4c8] sm:$0xff] %v3321_v23  ;;  %v1935_v30 = vadd.f32 %v1934_v22, %v4277_v46  ;;  %3348 = vtanh.f32 %v1933_v25  ;;  %v1745_v35 = vpop.f32.mrb[60].mxu1 }
 0x2ea   : > { %v3325_v29 = vpop.eup %3324  ;;  %2488 = vst [vmem:[%s4298_s26 + $0x4e0] sm:$0xff] %v3323_v26  ;;  %v1938_v45 = vpop.f32.mrb[124].mxu0  ;;  %3350 = vtanh.f32 %v1742_v27  ;;  %v1746_v61 = vadd.f32 %v1745_v35, %v4268_v17 }
 0x2eb   : > { %v3327_v40 = vpop.eup %3326  ;;  %2490 = vst [vmem:[%s4298_s26 + $0x4f0] sm:$0xff] %v3325_v29  ;;  %v1939_v4 = vadd.f32 %v1938_v45, %v4270_v20  ;;  %v1747_v7 = vpop.f32.mrb[61].mxu1  ;;  %3352 = vtanh.f32 %v1935_v30 }
 0x2ec   : > { %v3329_v32 = vpop.eup %3328  ;;  %2489 = vst [vmem:[%s4298_s26 + $0x4e8] sm:$0xff] %v3327_v40  ;;  %v1940_v28 = vpop.f32.mrb[125].mxu0  ;;  %v1748_v38 = vadd.f32 %v1747_v7, %v4275_v43  ;;  %3354 = vtanh.f32 %v1746_v61 }
 0x2ed   : > { %v3331_v41 = vpop.eup %3330  ;;  %2491 = vst [vmem:[%s4298_s26 + $0x4f8] sm:$0xff] %v3329_v32  ;;  %v1941_v60 = vadd.f32 %v1940_v28, %v4277_v46  ;;  %v1749_v37 = vpop.f32.mrb[62].mxu1  ;;  %3356 = vtanh.f32 %v1939_v4 }
 0x2ee   : > { %v3333_v31 = vpop.eup %3332  ;;  %2494 = vst [vmem:[%s4298_s26 + $0x510] sm:$0xff] %v3331_v41  ;;  %v1942_v21 = vpop.f32.mrb[126].mxu0  ;;  %v1750_v51 = vadd.f32 %v1749_v37, %v4268_v17  ;;  %3358 = vtanh.f32 %v1748_v38 }
 0x2ef   : > { %v3335_v24 = vpop.eup %3334  ;;  %2496 = vst [vmem:[%s4298_s26 + $0x520] sm:$0xff] %v3333_v31  ;;  %v1751_v39 = vpop.f32.mrb[63].mxu1  ;;  %v1943_v36 = vadd.f32 %v1942_v21, %v4270_v20  ;;  %3360 = vtanh.f32 %v1941_v60 }
 0x2f0   : > { %v1944_v54 = vpop.f32.mrb[127].mxu0  ;;  %v3337_v15 = vpop.eup %3336  ;;  %2495 = vst [vmem:[%s4298_s26 + $0x518] sm:$0xff] %v3335_v24  ;;  %v1752_v44 = vadd.f32 %v1751_v39, %v4275_v43  ;;  %3362 = vtanh.f32 %v1750_v51 }
 0x2f1   : > { %v3339_v19 = vpop.eup %3338  ;;  %2497 = vst [vmem:[%s4298_s26 + $0x528] sm:$0xff] %v3337_v15  ;;  %v1945_v17 = vadd.f32 %v1944_v54, %v4277_v46  ;;  %3364 = vtanh.f32 %v1943_v36  ;;  %v1981_v3 = vpop.f32.mrb[128].mxu0 }
 0x2f2   : > { %v3341_v11 = vpop.eup %3340  ;;  %2500 = vst [vmem:[%s4298_s26 + $0x540] sm:$0xff] %v3339_v19  ;;  %v2001_v43 = vpop.f32.mrb[64].mxu1  ;;  %3366 = vtanh.f32 %v1752_v44  ;;  %v1982_v33 = vadd.f32 %v1981_v3, %v4528_v8 }
 0x2f3   : > { %v3343_v42 = vpop.eup %3342  ;;  %2502 = vst [vmem:[%s4298_s26 + $0x550] sm:$0xff] %v3341_v11  ;;  %v2002_v0 = vadd.f32 %v2001_v43, %v4528_v8  ;;  %v1983_v46 = vpop.f32.mrb[129].mxu0  ;;  %3368 = vtanh.f32 %v1945_v17 }
 0x2f4   : > { %v3345_v20 = vpop.eup %3344  ;;  %2501 = vst [vmem:[%s4298_s26 + $0x548] sm:$0xff] %v3343_v42  ;;  %v2003_v47 = vpop.f32.mrb[65].mxu1  ;;  %v1984_v50 = vadd.f32 %v1983_v46, %v4532_v34  ;;  %3370 = vtanh.f32 %v1982_v33 }
 0x2f5   : > { %v3347_v9 = vpop.eup %3346  ;;  %2503 = vst [vmem:[%s4298_s26 + $0x558] sm:$0xff] %v3345_v20  ;;  %v2004_v52 = vadd.f32 %v2003_v47, %v4532_v34  ;;  %v1985_v53 = vpop.f32.mrb[130].mxu0  ;;  %3372 = vtanh.f32 %v2002_v0 }
 0x2f6   : > { %v3349_v49 = vpop.eup %3348  ;;  %2506 = vst [vmem:[%s4298_s26 + $0x570] sm:$0xff] %v3347_v9  ;;  %v2005_v55 = vpop.f32.mrb[66].mxu1  ;;  %v1986_v59 = vadd.f32 %v1985_v53, %v4528_v8  ;;  %3374 = vtanh.f32 %v1984_v50 }
 0x2f7   : > { %v3351_v57 = vpop.eup %3350  ;;  %2508 = vst [vmem:[%s4298_s26 + $0x580] sm:$0xff] %v3349_v49  ;;  %v1987_v62 = vpop.f32.mrb[131].mxu0  ;;  %v2006_v2 = vadd.f32 %v2005_v55, %v4528_v8  ;;  %3376 = vtanh.f32 %v2004_v52 }
 0x2f8   : > { %v2007_v63 = vpop.f32.mrb[67].mxu1  ;;  %v3353_v1 = vpop.eup %3352  ;;  %2507 = vst [vmem:[%s4298_s26 + $0x578] sm:$0xff] %v3351_v57  ;;  %v1988_v6 = vadd.f32 %v1987_v62, %v4532_v34  ;;  %3378 = vtanh.f32 %v1986_v59 }
 0x2f9   : > { %v3355_v5 = vpop.eup %3354  ;;  %2509 = vst [vmem:[%s4298_s26 + $0x588] sm:$0xff] %v3353_v1  ;;  %v2008_v12 = vadd.f32 %v2007_v63, %v4532_v34  ;;  %3380 = vtanh.f32 %v2006_v2  ;;  %v1991_v16 = vpop.f32.mrb[132].mxu0 }
 0x2fa   : > { %v3357_v10 = vpop.eup %3356  ;;  %2512 = vst [vmem:[%s4298_s26 + $0x5a0] sm:$0xff] %v3355_v5  ;;  %v2011_v18 = vpop.f32.mrb[68].mxu1  ;;  %3382 = vtanh.f32 %v1988_v6  ;;  %v1992_v23 = vadd.f32 %v1991_v16, %v4528_v8 }
 0x2fb   : > { %v3359_v13 = vpop.eup %3358  ;;  %2514 = vst [vmem:[%s4298_s26 + $0x5b0] sm:$0xff] %v3357_v10  ;;  %v2012_v25 = vadd.f32 %v2011_v18, %v4528_v8  ;;  %v1993_v26 = vpop.f32.mrb[133].mxu0  ;;  %3384 = vtanh.f32 %v2008_v12 }
 0x2fc   : > { %v3361_v14 = vpop.eup %3360  ;;  %2513 = vst [vmem:[%s4298_s26 + $0x5a8] sm:$0xff] %v3359_v13  ;;  %v2013_v27 = vpop.f32.mrb[69].mxu1  ;;  %v1994_v30 = vadd.f32 %v1993_v26, %v4532_v34  ;;  %3386 = vtanh.f32 %v1992_v23 }
 0x2fd   : > { %v3363_v22 = vpop.eup %3362  ;;  %2515 = vst [vmem:[%s4298_s26 + $0x5b8] sm:$0xff] %v3361_v14  ;;  %v2014_v40 = vadd.f32 %v2013_v27, %v4532_v34  ;;  %v1995_v32 = vpop.f32.mrb[134].mxu0  ;;  %3388 = vtanh.f32 %v2012_v25 }
 0x2fe   : > { %v3365_v29 = vpop.eup %3364  ;;  %2518 = vst [vmem:[%s4298_s26 + $0x5d0] sm:$0xff] %v3363_v22  ;;  %v2015_v35 = vpop.f32.mrb[70].mxu1  ;;  %v1996_v41 = vadd.f32 %v1995_v32, %v4528_v8  ;;  %3390 = vtanh.f32 %v1994_v30 }
 0x2ff   : > { %v3367_v45 = vpop.eup %3366  ;;  %2520 = vst [vmem:[%s4298_s26 + $0x5e0] sm:$0xff] %v3365_v29  ;;  %v1997_v58 = vpop.f32.mrb[135].mxu0  ;;  %v2016_v7 = vadd.f32 %v2015_v35, %v4528_v8  ;;  %3392 = vtanh.f32 %v2014_v40 }
 0x300   : > { %v2017_v61 = vpop.f32.mrb[71].mxu1  ;;  %v3369_v4 = vpop.eup %3368  ;;  %2519 = vst [vmem:[%s4298_s26 + $0x5d8] sm:$0xff] %v3367_v45  ;;  %v1998_v31 = vadd.f32 %v1997_v58, %v4532_v34  ;;  %3394 = vtanh.f32 %v1996_v41 }
 0x301   : > { %v3371_v28 = vpop.eup %3370  ;;  %2521 = vst [vmem:[%s4298_s26 + $0x5e8] sm:$0xff] %v3369_v4  ;;  %v2018_v38 = vadd.f32 %v2017_v61, %v4532_v34  ;;  %3396 = vtanh.f32 %v2016_v7  ;;  %v2021_v21 = vpop.f32.mrb[72].mxu1 }
 0x302   : > { %v3373_v56 = vpop.eup %3372  ;;  %2336 = vst [vmem:[%s4298_s26 + $0x20] sm:$0xff] %v3371_v28  ;;  %3398 = vtanh.f32 %v1998_v31  ;;  %v2022_v51 = vadd.f32 %v2021_v21, %v4528_v8  ;;  %v2023_v39 = vpop.f32.mrb[73].mxu1 }
 0x303   : > { %v3375_v60 = vpop.eup %3374  ;;  %2360 = vst [vmem:[%s4298_s26 + $0xe0] sm:$0xff] %v3373_v56  ;;  %3400 = vtanh.f32 %v2018_v38  ;;  %v2024_v15 = vadd.f32 %v2023_v39, %v4532_v34  ;;  %v2025_v36 = vpop.f32.mrb[74].mxu1 }
 0x304   : > { %v3377_v37 = vpop.eup %3376  ;;  %2337 = vst [vmem:[%s4298_s26 + $0x28] sm:$0xff] %v3375_v60  ;;  %3402 = vtanh.f32 %v2022_v51  ;;  %v2026_v44 = vadd.f32 %v2025_v36, %v4528_v8  ;;  %v2027_v48 = vpop.f32.mrb[75].mxu1 }
 0x305   : > { %v3379_v24 = vpop.eup %3378  ;;  %2361 = vst [vmem:[%s4298_s26 + $0xe8] sm:$0xff] %v3377_v37  ;;  %3404 = vtanh.f32 %v2024_v15  ;;  %v2028_v17 = vadd.f32 %v2027_v48, %v4532_v34 }
 0x306   : > { %v3381_v54 = vpop.eup %3380  ;;  %2342 = vst [vmem:[%s4298_s26 + $0x50] sm:$0xff] %v3379_v24  ;;  %3406 = vtanh.f32 %v2026_v44 }
 0x307   : > { %v3383_v19 = vpop.eup %3382  ;;  %2366 = vst [vmem:[%s4298_s26 + $0x110] sm:$0xff] %v3381_v54  ;;  %3408 = vtanh.f32 %v2028_v17 }
 0x308   : > { %v3385_v11 = vpop.eup %3384  ;;  %2343 = vst [vmem:[%s4298_s26 + $0x58] sm:$0xff] %v3383_v19 }
 0x309   : > { %v3387_v42 = vpop.eup %3386  ;;  %2367 = vst [vmem:[%s4298_s26 + $0x118] sm:$0xff] %v3385_v11  ;;  %v2031_v9 = vpop.f32.mrb[76].mxu1 }
 0x30a   : > { %v3389_v20 = vpop.eup %3388  ;;  %2348 = vst [vmem:[%s4298_s26 + $0x80] sm:$0xff] %v3387_v42  ;;  %v2032_v0 = vadd.f32 %v2031_v9, %v4528_v8  ;;  %v2033_v46 = vpop.f32.mrb[77].mxu1 }
 0x30b   : > { %v3391_v3 = vpop.eup %3390  ;;  %2372 = vst [vmem:[%s4298_s26 + $0x140] sm:$0xff] %v3389_v20  ;;  %v2034_v49 = vadd.f32 %v2033_v46, %v4532_v34  ;;  %v2035_v50 = vpop.f32.mrb[78].mxu1 }
 0x30c   : > { %v3393_v43 = vpop.eup %3392  ;;  %2349 = vst [vmem:[%s4298_s26 + $0x88] sm:$0xff] %v3391_v3  ;;  %3410 = vtanh.f32 %v2032_v0  ;;  %v2036_v53 = vadd.f32 %v2035_v50, %v4528_v8  ;;  %v2037_v55 = vpop.f32.mrb[79].mxu1 }
 0x30d   : > { %v3395_v33 = vpop.eup %3394  ;;  %2373 = vst [vmem:[%s4298_s26 + $0x148] sm:$0xff] %v3393_v43  ;;  %3412 = vtanh.f32 %v2034_v49  ;;  %v2038_v59 = vadd.f32 %v2037_v55, %v4532_v34 }
 0x30e   : > { %v3397_v47 = vpop.eup %3396  ;;  %2354 = vst [vmem:[%s4298_s26 + $0xb0] sm:$0xff] %v3395_v33  ;;  %3414 = vtanh.f32 %v2036_v53 }
 0x30f   : > { %v3399_v52 = vpop.eup %3398  ;;  %2378 = vst [vmem:[%s4298_s26 + $0x170] sm:$0xff] %v3397_v47  ;;  %3416 = vtanh.f32 %v2038_v59 }
 0x310   : > { %v3401_v57 = vpop.eup %3400  ;;  %2355 = vst [vmem:[%s4298_s26 + $0xb8] sm:$0xff] %v3399_v52 }
 0x311   : > { %v3403_v62 = vpop.eup %3402  ;;  %2379 = vst [vmem:[%s4298_s26 + $0x178] sm:$0xff] %v3401_v57  ;;  %v2041_v5 = vpop.f32.mrb[80].mxu1 }
 0x312   : > { %v3405_v63 = vpop.eup %3404  ;;  %2384 = vst [vmem:[%s4298_s26 + $0x1a0] sm:$0xff] %v3403_v62  ;;  %v2042_v6 = vadd.f32 %v2041_v5, %v4528_v8  ;;  %v2043_v10 = vpop.f32.mrb[81].mxu1 }
 0x313   : > { %v3407_v1 = vpop.eup %3406  ;;  %2385 = vst [vmem:[%s4298_s26 + $0x1a8] sm:$0xff] %v3405_v63  ;;  %v2044_v12 = vadd.f32 %v2043_v10, %v4532_v34  ;;  %v2045_v13 = vpop.f32.mrb[82].mxu1 }
 0x314   : > { %v3409_v2 = vpop.eup %3408  ;;  %2390 = vst [vmem:[%s4298_s26 + $0x1d0] sm:$0xff] %v3407_v1  ;;  %3418 = vtanh.f32 %v2042_v6  ;;  %v2046_v14 = vadd.f32 %v2045_v13, %v4528_v8  ;;  %v2047_v16 = vpop.f32.mrb[83].mxu1 }
 0x315   : > { %2391 = vst [vmem:[%s4298_s26 + $0x1d8] sm:$0xff] %v3409_v2  ;;  %3420 = vtanh.f32 %v2044_v12  ;;  %v2048_v18 = vadd.f32 %v2047_v16, %v4532_v34 }
 0x316   : > { %v3411_v22 = vpop.eup %3410  ;;  %3422 = vtanh.f32 %v2046_v14 }
 0x317   : > { %v3413_v23 = vpop.eup %3412  ;;  %2396 = vst [vmem:[%s4298_s26 + $0x200] sm:$0xff] %v3411_v22  ;;  %3424 = vtanh.f32 %v2048_v18 }
 0x318   : > { %v3415_v25 = vpop.eup %3414  ;;  %2397 = vst [vmem:[%s4298_s26 + $0x208] sm:$0xff] %v3413_v23 }
 0x319   : > { %v3417_v26 = vpop.eup %3416  ;;  %2402 = vst [vmem:[%s4298_s26 + $0x230] sm:$0xff] %v3415_v25  ;;  %v2051_v27 = vpop.f32.mrb[84].mxu1 }
 0x31a   : > { %2403 = vst [vmem:[%s4298_s26 + $0x238] sm:$0xff] %v3417_v26  ;;  %v2052_v29 = vadd.f32 %v2051_v27, %v4528_v8  ;;  %v2053_v30 = vpop.f32.mrb[85].mxu1 }
 0x31b   : > { %v2054_v40 = vadd.f32 %v2053_v30, %v4532_v34  ;;  %v2055_v32 = vpop.f32.mrb[86].mxu1 }
 0x31c   : > { %3426 = vtanh.f32 %v2052_v29  ;;  %v2056_v35 = vadd.f32 %v2055_v32, %v4528_v8  ;;  %v2057_v45 = vpop.f32.mrb[87].mxu1 }
 0x31d   : > { %3428 = vtanh.f32 %v2054_v40  ;;  %v2058_v41 = vadd.f32 %v2057_v45, %v4532_v34 }
 0x31e   : > { %v3419_v58 = vpop.eup %3418  ;;  %3430 = vtanh.f32 %v2056_v35 }
 0x31f   : > { %v3421_v61 = vpop.eup %3420  ;;  %2408 = vst [vmem:[%s4298_s26 + $0x260] sm:$0xff] %v3419_v58  ;;  %3432 = vtanh.f32 %v2058_v41 }
 0x320   : > { %v3423_v4 = vpop.eup %3422  ;;  %2409 = vst [vmem:[%s4298_s26 + $0x268] sm:$0xff] %v3421_v61 }
 0x321   : > { %v3425_v7 = vpop.eup %3424  ;;  %2414 = vst [vmem:[%s4298_s26 + $0x290] sm:$0xff] %v3423_v4  ;;  %v2061_v28 = vpop.f32.mrb[88].mxu1 }
 0x322   : > { %2415 = vst [vmem:[%s4298_s26 + $0x298] sm:$0xff] %v3425_v7  ;;  %v2062_v31 = vadd.f32 %v2061_v28, %v4528_v8  ;;  %v2063_v56 = vpop.f32.mrb[89].mxu1 }
 0x323   : > { %v2064_v38 = vadd.f32 %v2063_v56, %v4532_v34  ;;  %v2065_v60 = vpop.f32.mrb[90].mxu1 }
 0x324   : > { %3434 = vtanh.f32 %v2062_v31  ;;  %v2066_v37 = vadd.f32 %v2065_v60, %v4528_v8  ;;  %v2067_v21 = vpop.f32.mrb[91].mxu1 }
 0x325   : > { %3436 = vtanh.f32 %v2064_v38  ;;  %v2068_v24 = vadd.f32 %v2067_v21, %v4532_v34 }
 0x326   : > { %v3427_v51 = vpop.eup %3426  ;;  %3438 = vtanh.f32 %v2066_v37 }
 0x327   : > { %v3429_v39 = vpop.eup %3428  ;;  %2420 = vst [vmem:[%s4298_s26 + $0x2c0] sm:$0xff] %v3427_v51  ;;  %3440 = vtanh.f32 %v2068_v24 }
 0x328   : > { %v3431_v54 = vpop.eup %3430  ;;  %2421 = vst [vmem:[%s4298_s26 + $0x2c8] sm:$0xff] %v3429_v39 }
 0x329   : > { %v3433_v15 = vpop.eup %3432  ;;  %2426 = vst [vmem:[%s4298_s26 + $0x2f0] sm:$0xff] %v3431_v54  ;;  %v2071_v36 = vpop.f32.mrb[92].mxu1 }
 0x32a   : > { %2427 = vst [vmem:[%s4298_s26 + $0x2f8] sm:$0xff] %v3433_v15  ;;  %v2072_v19 = vadd.f32 %v2071_v36, %v4528_v8  ;;  %v2073_v44 = vpop.f32.mrb[93].mxu1 }
 0x32b   : > { %v2074_v48 = vadd.f32 %v2073_v44, %v4532_v34  ;;  %v2075_v11 = vpop.f32.mrb[94].mxu1 }
 0x32c   : > { %3442 = vtanh.f32 %v2072_v19  ;;  %v2076_v17 = vadd.f32 %v2075_v11, %v4528_v8  ;;  %v2077_v42 = vpop.f32.mrb[95].mxu1 }
 0x32d   : > { %3444 = vtanh.f32 %v2074_v48  ;;  %v2078_v20 = vadd.f32 %v2077_v42, %v4532_v34 }
 0x32e   : > { %v3435_v3 = vpop.eup %3434  ;;  %3446 = vtanh.f32 %v2076_v17 }
 0x32f   : > { %v3437_v43 = vpop.eup %3436  ;;  %2432 = vst [vmem:[%s4298_s26 + $0x320] sm:$0xff] %v3435_v3  ;;  %3448 = vtanh.f32 %v2078_v20 }
 0x330   : > { %v3439_v9 = vpop.eup %3438  ;;  %2433 = vst [vmem:[%s4298_s26 + $0x328] sm:$0xff] %v3437_v43 }
 0x331   : > { %v3441_v33 = vpop.eup %3440  ;;  %2438 = vst [vmem:[%s4298_s26 + $0x350] sm:$0xff] %v3439_v9  ;;  %v2081_v0 = vpop.f32.mrb[96].mxu1 }
 0x332   : > { %2439 = vst [vmem:[%s4298_s26 + $0x358] sm:$0xff] %v3441_v33  ;;  %v2082_v46 = vadd.f32 %v2081_v0, %v4528_v8  ;;  %v2083_v47 = vpop.f32.mrb[97].mxu1 }
 0x333   : > { %v2084_v49 = vadd.f32 %v2083_v47, %v4532_v34  ;;  %v2085_v50 = vpop.f32.mrb[98].mxu1 }
 0x334   : > { %3450 = vtanh.f32 %v2082_v46  ;;  %v2086_v52 = vadd.f32 %v2085_v50, %v4528_v8  ;;  %v2087_v53 = vpop.f32.mrb[99].mxu1 }
 0x335   : > { %3452 = vtanh.f32 %v2084_v49  ;;  %v2088_v55 = vadd.f32 %v2087_v53, %v4532_v34 }
 0x336   : > { %v3443_v57 = vpop.eup %3442  ;;  %3454 = vtanh.f32 %v2086_v52 }
 0x337   : > { %v3445_v59 = vpop.eup %3444  ;;  %2444 = vst [vmem:[%s4298_s26 + $0x380] sm:$0xff] %v3443_v57  ;;  %3456 = vtanh.f32 %v2088_v55 }
 0x338   : > { %v3447_v62 = vpop.eup %3446  ;;  %2445 = vst [vmem:[%s4298_s26 + $0x388] sm:$0xff] %v3445_v59 }
 0x339   : > { %v3449_v63 = vpop.eup %3448  ;;  %2450 = vst [vmem:[%s4298_s26 + $0x3b0] sm:$0xff] %v3447_v62  ;;  %v2091_v1 = vpop.f32.mrb[100].mxu1 }
 0x33a   : > { %2451 = vst [vmem:[%s4298_s26 + $0x3b8] sm:$0xff] %v3449_v63  ;;  %v2092_v2 = vadd.f32 %v2091_v1, %v4528_v8  ;;  %v2093_v5 = vpop.f32.mrb[101].mxu1 }
 0x33b   : > { %v2094_v6 = vadd.f32 %v2093_v5, %v4532_v34  ;;  %v2095_v10 = vpop.f32.mrb[102].mxu1 }
 0x33c   : > { %3458 = vtanh.f32 %v2092_v2  ;;  %v2096_v12 = vadd.f32 %v2095_v10, %v4528_v8  ;;  %v2097_v13 = vpop.f32.mrb[103].mxu1 }
 0x33d   : > { %3460 = vtanh.f32 %v2094_v6  ;;  %v2098_v14 = vadd.f32 %v2097_v13, %v4532_v34 }
 0x33e   : > { %v3451_v16 = vpop.eup %3450  ;;  %3462 = vtanh.f32 %v2096_v12 }
 0x33f   : > { %v3453_v18 = vpop.eup %3452  ;;  %2456 = vst [vmem:[%s4298_s26 + $0x3e0] sm:$0xff] %v3451_v16  ;;  %3464 = vtanh.f32 %v2098_v14 }
 0x340   : > { %v3455_v22 = vpop.eup %3454  ;;  %2457 = vst [vmem:[%s4298_s26 + $0x3e8] sm:$0xff] %v3453_v18 }
 0x341   : > { %v3457_v23 = vpop.eup %3456  ;;  %2462 = vst [vmem:[%s4298_s26 + $0x410] sm:$0xff] %v3455_v22  ;;  %v2101_v25 = vpop.f32.mrb[104].mxu1 }
 0x342   : > { %2463 = vst [vmem:[%s4298_s26 + $0x418] sm:$0xff] %v3457_v23  ;;  %v2102_v26 = vadd.f32 %v2101_v25, %v4528_v8  ;;  %v2103_v27 = vpop.f32.mrb[105].mxu1 }
 0x343   : > { %v2104_v29 = vadd.f32 %v2103_v27, %v4532_v34  ;;  %v2105_v30 = vpop.f32.mrb[106].mxu1 }
 0x344   : > { %3466 = vtanh.f32 %v2102_v26  ;;  %v2106_v40 = vadd.f32 %v2105_v30, %v4528_v8  ;;  %v2107_v32 = vpop.f32.mrb[107].mxu1 }
 0x345   : > { %3468 = vtanh.f32 %v2104_v29  ;;  %v2108_v35 = vadd.f32 %v2107_v32, %v4532_v34 }
 0x346   : > { %v3459_v45 = vpop.eup %3458  ;;  %3470 = vtanh.f32 %v2106_v40 }
 0x347   : > { %v3461_v41 = vpop.eup %3460  ;;  %2468 = vst [vmem:[%s4298_s26 + $0x440] sm:$0xff] %v3459_v45  ;;  %3472 = vtanh.f32 %v2108_v35 }
 0x348   : > { %v3463_v58 = vpop.eup %3462  ;;  %2469 = vst [vmem:[%s4298_s26 + $0x448] sm:$0xff] %v3461_v41 }
 0x349   : > { %v3465_v61 = vpop.eup %3464  ;;  %2474 = vst [vmem:[%s4298_s26 + $0x470] sm:$0xff] %v3463_v58  ;;  %v2111_v4 = vpop.f32.mrb[108].mxu1 }
 0x34a   : > { %2475 = vst [vmem:[%s4298_s26 + $0x478] sm:$0xff] %v3465_v61  ;;  %v2112_v7 = vadd.f32 %v2111_v4, %v4528_v8  ;;  %v2113_v28 = vpop.f32.mrb[109].mxu1 }
 0x34b   : > { %v2114_v31 = vadd.f32 %v2113_v28, %v4532_v34  ;;  %v2115_v56 = vpop.f32.mrb[110].mxu1 }
 0x34c   : > { %3474 = vtanh.f32 %v2112_v7  ;;  %v2116_v38 = vadd.f32 %v2115_v56, %v4528_v8  ;;  %v2117_v60 = vpop.f32.mrb[111].mxu1 }
 0x34d   : > { %3476 = vtanh.f32 %v2114_v31  ;;  %v2118_v37 = vadd.f32 %v2117_v60, %v4532_v34 }
 0x34e   : > { %v3467_v21 = vpop.eup %3466  ;;  %3478 = vtanh.f32 %v2116_v38 }
 0x34f   : > { %v3469_v24 = vpop.eup %3468  ;;  %2480 = vst [vmem:[%s4298_s26 + $0x4a0] sm:$0xff] %v3467_v21  ;;  %3480 = vtanh.f32 %v2118_v37 }
 0x350   : > { %v3471_v51 = vpop.eup %3470  ;;  %2481 = vst [vmem:[%s4298_s26 + $0x4a8] sm:$0xff] %v3469_v24 }
 0x351   : > { %v3473_v39 = vpop.eup %3472  ;;  %2486 = vst [vmem:[%s4298_s26 + $0x4d0] sm:$0xff] %v3471_v51  ;;  %v2121_v54 = vpop.f32.mrb[112].mxu1 }
 0x352   : > { %2487 = vst [vmem:[%s4298_s26 + $0x4d8] sm:$0xff] %v3473_v39  ;;  %v2122_v15 = vadd.f32 %v2121_v54, %v4528_v8  ;;  %v2123_v36 = vpop.f32.mrb[113].mxu1 }
 0x353   : > { %v2124_v19 = vadd.f32 %v2123_v36, %v4532_v34  ;;  %v2125_v44 = vpop.f32.mrb[114].mxu1 }
 0x354   : > { %3482 = vtanh.f32 %v2122_v15  ;;  %v2126_v48 = vadd.f32 %v2125_v44, %v4528_v8  ;;  %v2127_v11 = vpop.f32.mrb[115].mxu1 }
 0x355   : > { %3484 = vtanh.f32 %v2124_v19  ;;  %v2128_v17 = vadd.f32 %v2127_v11, %v4532_v34 }
 0x356   : > { %v3475_v42 = vpop.eup %3474  ;;  %3486 = vtanh.f32 %v2126_v48 }
 0x357   : > { %v3477_v20 = vpop.eup %3476  ;;  %2492 = vst [vmem:[%s4298_s26 + $0x500] sm:$0xff] %v3475_v42  ;;  %3488 = vtanh.f32 %v2128_v17 }
 0x358   : > { %v3479_v3 = vpop.eup %3478  ;;  %2493 = vst [vmem:[%s4298_s26 + $0x508] sm:$0xff] %v3477_v20 }
 0x359   : > { %v3481_v43 = vpop.eup %3480  ;;  %2498 = vst [vmem:[%s4298_s26 + $0x530] sm:$0xff] %v3479_v3  ;;  %v2131_v9 = vpop.f32.mrb[116].mxu1 }
 0x35a   : > { %2499 = vst [vmem:[%s4298_s26 + $0x538] sm:$0xff] %v3481_v43  ;;  %v2132_v33 = vadd.f32 %v2131_v9, %v4528_v8  ;;  %v2133_v0 = vpop.f32.mrb[117].mxu1 }
 0x35b   : > { %v2134_v46 = vadd.f32 %v2133_v0, %v4532_v34  ;;  %v2135_v47 = vpop.f32.mrb[118].mxu1 }
 0x35c   : > { %3490 = vtanh.f32 %v2132_v33  ;;  %v2136_v49 = vadd.f32 %v2135_v47, %v4528_v8  ;;  %v2137_v50 = vpop.f32.mrb[119].mxu1 }
 0x35d   : > { %3492 = vtanh.f32 %v2134_v46  ;;  %v2138_v52 = vadd.f32 %v2137_v50, %v4532_v34 }
 0x35e   : > { %v3483_v53 = vpop.eup %3482  ;;  %3494 = vtanh.f32 %v2136_v49 }
 0x35f   : > { %v3485_v55 = vpop.eup %3484  ;;  %2504 = vst [vmem:[%s4298_s26 + $0x560] sm:$0xff] %v3483_v53  ;;  %3496 = vtanh.f32 %v2138_v52 }
 0x360   : > { %v3487_v57 = vpop.eup %3486  ;;  %2505 = vst [vmem:[%s4298_s26 + $0x568] sm:$0xff] %v3485_v55 }
 0x361   : > { %v3489_v59 = vpop.eup %3488  ;;  %2510 = vst [vmem:[%s4298_s26 + $0x590] sm:$0xff] %v3487_v57 }
 0x362   : > { %2511 = vst [vmem:[%s4298_s26 + $0x598] sm:$0xff] %v3489_v59 }
 0x366   : > { %v3491_v8 = vpop.eup %3490 }
 0x367   : > { %v3493_v62 = vpop.eup %3492  ;;  %2516 = vst [vmem:[%s4298_s26 + $0x5c0] sm:$0xff] %v3491_v8 }
 0x368   : > { %v3495_v34 = vpop.eup %3494  ;;  %2517 = vst [vmem:[%s4298_s26 + $0x5c8] sm:$0xff] %v3493_v62 }
 0x369   : > { %v3497_v63 = vpop.eup %3496  ;;  %2522 = vst [vmem:[%s4298_s26 + $0x5f0] sm:$0xff] %v3495_v34 }
 0x36a   : > { %2523 = vst [vmem:[%s4298_s26 + $0x5f8] sm:$0xff] %v3497_v63 }
 0x36b   : > { %3654 = shalt.err (!%p3651_p13)
}
 0x36c   : > { %s3655_s28 = scalar_lea.hbm %s4679_s16, 24576  ;;  %s3659_s7 = scalar_lea.hbm %s4733_s5, 49152 }
 0x36d   : > { %p3656_p9 = scmp.ne.s32.totalorder %s4679_s16, %s3655_s28  ;;  %p3660_p6 = scmp.lt.u32.totalorder %s4679_s16, %s4733_s5 }
 0x36e   : > { %p3661_p10 = scmp.lt.u32.totalorder %s3659_s7, %s3655_s28  ;;  %p3663_p4 = scmp.lt.u32.totalorder %s3655_s28, %s4679_s16 }
 0x36f   : > { %p3657_p0 = pnand %p3656_p9, %p3928_p8 }
 0x370   : > { %p3662_p3 = por %p3661_p10, %p3660_p6 }
 0x371   : > { %p3658_p11 = pneg %p3657_p0 }
 0x372   : > { %p3664_p5 = por %p3663_p4, %p3662_p3 }
 0x374   : > { %p3665_p7 = pnand %p3664_p5, %p3658_p11 }
 0x376   : > { %3668 = shalt.err (!%p3665_p7)
}
 0x377   : > { %s3730_s8 = smov 768   ;;  %s3731_s11 = smov 48  }
 0x378   : > { %2852 = dma.vmem_to_hbm [thread:$0]  (%p3928_p8), %s4682_s10, 24576, %s4679_s16, %s2525_s22, %s3730_s8, %s3730_s8, %s3731_s11  }
 0x379 PF: > { %s2554_s27 = sand.u32 1, %s3703_s18   ;;  %p4751_p12 = scmp.ne.s32.totalorder %s4738_s25, 0 }
 0x37a   : > { %p4752_p2 = scmp.ge.s32.totalorder %s3715_s21, 2  ;;  %s2555_s23 = scalar_lea.sflag [#allocation4], %s2554_s27 }
 0x37c   : > { %p2872_p1 = pnand %p4752_p2, %p4751_p12 }
 0x37e   : > { %3698 = dma.done.wait (!%p2872_p1), %s2555_s23, 24576  }
 0x37f   : > { %3700 = vsyncadd (!%p2872_p1), %s2555_s23, 4294942720  ;;  %p20_p13 = scmp.ge.s32.totalorder %s3915_s12, 4   ;;  %s4753_s18 = smov %s3707_s19 }
 0x380   : > { %s4754_s19 = smov %s3711_s20  ;;  %s4755_s20 = smov %s3924_s14 }
 0x381   : > { %s4756_s21 = smov %s3915_s12  ;;  %22 = sbr.rel (!%p20_p13) target bundleno = 7 (0x7), region = 101 }
 0x388   :  { %2560 = vsyncpa [#allocation3], 1 }
 0x389   :  { %2562 = vsyncpa [#allocation3 + $0x1], 1 }
 0x38a   :  { %2563 = vsyncpa [#allocation6], 1 }
 0x38b   :  { %2564 = vsyncpa [#allocation9], 1 }
 0x38c   :  { %2565 = vsyncpa [#allocation4], 1 }
 0x38d   :  { %2567 = vsyncpa [#allocation4 + $0x1], 1 }

</bundles_post_ra>
